<compile_context>
chip_gen: v6e
topology: v6e:2x2x1
jax: 0.10.0
libtpu: 0.0.40
codegen_flags: <defaults>
</compile_context>

<pallas_src>
import jax
import jax.numpy as jnp
from jax.experimental import pallas as pl
from jax.experimental.pallas import tpu as pltpu


def _round_up(x, m):
    return ((x + m - 1) // m) * m


# ----------------------------------------------------------------------------
# Pallas kernel.
# Grid: (B, T_tiles, V_tiles).  Refs (after None/squeeze):
#   fwd_ref, bwd_ref : (tt, E)        input embeddings (f32)
#   wg_ref, wu_ref   : (D, H)         SwiGLU gate / up weights (bf16)
#   wd_ref           : (H, D)         MLP down projection (bf16)
#   lnw_ref          : (1, D)         LayerNorm weight (f32)
#   wlm_ref          : (E, tv)        lm_head weight tile (bf16)
#   out_ref          : (2, tt, tv)    logits [next, prev] tile (f32)
#   yn_ref (scratch) : (2*tt, E)      normalized next/prev halves, bf16
# ----------------------------------------------------------------------------
def _text_head_kernel(fwd_ref, bwd_ref, wg_ref, wu_ref, wd_ref, lnw_ref, wlm_ref,
                      out_ref, yn_ref):
    tt, n_embd = fwd_ref.shape
    k = pl.program_id(2)   # vocab-tile index (innermost, "arbitrary")

    # SwiGLU + residual + LayerNorm: only once per row tile, reused for all
    # vocab tiles via the VMEM scratch.
    @pl.when(k == 0)
    def _compute_yn():
        xf = fwd_ref[...].astype(jnp.float32)
        xb = bwd_ref[...].astype(jnp.float32)
        x = jnp.concatenate([xf, xb], axis=-1)                      # (tt, D) f32
        x16 = x.astype(jnp.bfloat16)

        g = jnp.dot(x16, wg_ref[...], preferred_element_type=jnp.float32)
        u = jnp.dot(x16, wu_ref[...], preferred_element_type=jnp.float32)
        h = g * jax.nn.sigmoid(g) * u                               # silu(g) * u, f32

        y = x + jnp.dot(h.astype(jnp.bfloat16), wd_ref[...],
                        preferred_element_type=jnp.float32)         # (tt, D)

        # LayerNorm(input_dim, bias=False), eps = 1e-5, f32 statistics.
        mean = jnp.mean(y, axis=-1, keepdims=True)
        var = jnp.mean(jnp.square(y - mean), axis=-1, keepdims=True)
        yn = (y - mean) * jax.lax.rsqrt(var + 1e-5) * lnw_ref[...].astype(jnp.float32)

        # chunk(2, dim=-1): stack next/prev halves along rows so the tied
        # lm_head runs as ONE matmul per vocab tile.  (E is a multiple of 128,
        # so the lane-boundary slice is layout-free.)
        yn_ref[:tt, :] = yn[:, :n_embd].astype(jnp.bfloat16)
        yn_ref[tt:, :] = yn[:, n_embd:].astype(jnp.bfloat16)

    logits = jnp.dot(yn_ref[...], wlm_ref[...],
                     preferred_element_type=jnp.float32)            # (2*tt, tv)
    out_ref[0, :, :] = logits[:tt, :]                               # logits_next
    out_ref[1, :, :] = logits[tt:, :]                               # logits_prev


# ----------------------------------------------------------------------------
# Wrapper — inference path of TextHead.forward (targets are None).
# ----------------------------------------------------------------------------
def text_head_forward(forward_embedding, backward_embedding, params,
                      *, row_tile=256, vocab_tile=1024):
    """Returns logits of shape [B, 2, T, vocab] (== torch.stack([next, prev], 1))."""
    wg, wu, wd, ln_w, wlm = params
    B, T, E = forward_embedding.shape
    D = 2 * E
    H = wg.shape[1]
    V = wlm.shape[1]

    # bf16 MXU operands (accumulation is f32 inside the kernel); LN weight stays f32.
    wg16 = wg.astype(jnp.bfloat16)
    wu16 = wu.astype(jnp.bfloat16)
    wd16 = wd.astype(jnp.bfloat16)
    wlm16 = wlm.astype(jnp.bfloat16)

    # Row (sequence) tiling: multiple of 8 sublanes, at most `row_tile`.
    tt = int(min(row_tile, _round_up(T, 8)))
    tt = max(8, (tt // 8) * 8)
    Tp = _round_up(T, tt)

    # Vocab tiling: lane-dense multiple of 128, at most `vocab_tile`.
    tv = int(min(vocab_tile, _round_up(V, 128)))
    tv = max(128, (tv // 128) * 128)
    Vp = _round_up(V, tv)

    fwd = forward_embedding
    bwd = backward_embedding
    if Tp != T:
        pad = [(0, 0), (0, Tp - T), (0, 0)]
        fwd = jnp.pad(fwd, pad)
        bwd = jnp.pad(bwd, pad)
    if Vp != V:
        wlm16 = jnp.pad(wlm16, [(0, 0), (0, Vp - V)])

    grid = (B, Tp // tt, Vp // tv)

    out = pl.pallas_call(
        _text_head_kernel,
        out_shape=jax.ShapeDtypeStruct((B, 2, Tp, Vp), jnp.float32),
        grid_spec=pltpu.PrefetchScalarGridSpec(
            num_scalar_prefetch=0,
            grid=grid,
            in_specs=[
                pl.BlockSpec((None, tt, E), lambda b, i, k: (b, i, 0)),  # fwd rows
                pl.BlockSpec((None, tt, E), lambda b, i, k: (b, i, 0)),  # bwd rows
                pl.BlockSpec((D, H), lambda b, i, k: (0, 0)),            # Wg
                pl.BlockSpec((D, H), lambda b, i, k: (0, 0)),            # Wu
                pl.BlockSpec((H, D), lambda b, i, k: (0, 0)),            # Wd
                pl.BlockSpec((1, D), lambda b, i, k: (0, 0)),            # LN weight
                pl.BlockSpec((E, tv), lambda b, i, k: (0, k)),           # lm_head tile
            ],
            out_specs=pl.BlockSpec((None, 2, tt, tv), lambda b, i, k: (b, 0, i, k)),
            scratch_shapes=[pltpu.VMEM((2 * tt, E), jnp.bfloat16)],
        ),
        compiler_params=pltpu.CompilerParams(
            dimension_semantics=("parallel", "parallel", "arbitrary"),
            vmem_limit_bytes=48 * 1024 * 1024,
        ),
    )(fwd, bwd, wg16, wu16, wd16, ln_w, wlm16)

    if Tp != T or Vp != V:
        out = out[:, :, :T, :V]
    return out


# ----------------------------------------------------------------------------
# Deterministic parameter construction (matches module __init__ shapes).
# Weights stored [in_features, out_features] (transposed relative to nn.Linear).
# ----------------------------------------------------------------------------
def make_params(key, n_embd, vocab_size):
    input_dim = 2 * n_embd
    hidden_dim = 8 * input_dim / 3
    hidden_dim = 128 * round(hidden_dim / 128)

    k1, k2, k3, k4 = jax.random.split(key, 4)
    std = 0.02
    wg = (std * jax.random.normal(k1, (input_dim, hidden_dim))).astype(jnp.float32)
    wu = (std * jax.random.normal(k2, (input_dim, hidden_dim))).astype(jnp.float32)
    wd = (std * jax.random.normal(k3, (hidden_dim, input_dim))).astype(jnp.float32)
    ln_w = jnp.ones((1, input_dim), jnp.float32)     # LayerNorm weight init = ones
    wlm = (std * jax.random.normal(k4, (n_embd, vocab_size))).astype(jnp.float32)
    return (wg, wu, wd, ln_w, wlm)


def _reference(forward_embedding, backward_embedding, params):
    """Pure-JAX (f32) reference of the same forward pass."""
    wg, wu, wd, ln_w, wlm = params
    E = forward_embedding.shape[-1]
    x = jnp.concatenate([forward_embedding, backward_embedding], axis=-1)
    g = x @ wg
    u = x @ wu
    h = jax.nn.silu(g) * u
    y = x + h @ wd
    mean = jnp.mean(y, axis=-1, keepdims=True)
    var = jnp.mean(jnp.square(y - mean), axis=-1, keepdims=True)
    yn = (y - mean) * jax.lax.rsqrt(var + 1e-5) * ln_w[0]
    x_next, x_prev = yn[..., :E], yn[..., E:]
    return jnp.stack([x_next @ wlm, x_prev @ wlm], axis=1)


if __name__ == "__main__":
    # Small shapes consistent with the module: n_embd=128 -> input_dim=256,
    # hidden_dim = 128*round(8*256/3/128) = 640, vocab=256, batch=2, seq=8.
    B, T, n_embd, vocab = 2, 8, 128, 256

    key = jax.random.PRNGKey(0)
    k_params, k_fwd, k_bwd = jax.random.split(key, 3)

    params = make_params(k_params, n_embd, vocab)
    fwd_emb = jax.random.normal(k_fwd, (B, T, n_embd), dtype=jnp.float32)
    bwd_emb = jax.random.normal(k_bwd, (B, T, n_embd), dtype=jnp.float32)

    # vocab_tile=128 so the demo exercises the tiled-vocab path (2 vocab tiles)
    # and the yn-scratch reuse across vocab tiles.
    logits = text_head_forward(fwd_emb, bwd_emb, params, vocab_tile=128)
    logits = jax.block_until_ready(logits)
    assert logits.shape == (B, 2, T, vocab), logits.shape

    ref = _reference(fwd_emb, bwd_emb, params)
    max_err = float(jnp.max(jnp.abs(logits - ref)))
    # bf16 MXU inputs with f32 accumulation -> tolerance loosened vs f32 reference.
    assert jnp.allclose(logits, ref, rtol=3e-2, atol=3e-2), max_err

    print("KERNEL_OK")
</pallas_src>

<mosaic_0001>
module attributes {stable_mosaic.version = 11 : i64} {
  func.func @_text_head_kernel(%arg0: i32, %arg1: i32, %arg2: i32, %arg3: memref<1x8x128xf32, #tpu.memory_space<vmem>>, %arg4: memref<1x8x128xf32, #tpu.memory_space<vmem>>, %arg5: memref<256x640xbf16, #tpu.memory_space<vmem>>, %arg6: memref<256x640xbf16, #tpu.memory_space<vmem>>, %arg7: memref<640x256xbf16, #tpu.memory_space<vmem>>, %arg8: memref<1x256xf32, #tpu.memory_space<vmem>>, %arg9: memref<128x128xbf16, #tpu.memory_space<vmem>>, %arg10: memref<1x2x8x128xf32, #tpu.memory_space<vmem>>, %arg11: memref<16x128xbf16, #tpu.memory_space<vmem>>) attributes {dimension_semantics = [#tpu.dimension_semantics<parallel>, #tpu.dimension_semantics<parallel>, #tpu.dimension_semantics<arbitrary>], iteration_bounds = array<i64: 2, 1, 2>, scalar_prefetch = 0 : i64, scratch_operands = 1 : i64, tpu.core_type = #tpu.core_type<tc>, window_params = [{transform_indices = @transform_0, window_bounds = array<i64: 1, 8, 128>}, {transform_indices = @transform_1, window_bounds = array<i64: 1, 8, 128>}, {pipeline_mode = #tpu.pipeline_mode<synchronous>, transform_indices = @transform_2, window_bounds = array<i64: 256, 640>}, {pipeline_mode = #tpu.pipeline_mode<synchronous>, transform_indices = @transform_3, window_bounds = array<i64: 256, 640>}, {pipeline_mode = #tpu.pipeline_mode<synchronous>, transform_indices = @transform_4, window_bounds = array<i64: 640, 256>}, {pipeline_mode = #tpu.pipeline_mode<synchronous>, transform_indices = @transform_5, window_bounds = array<i64: 1, 256>}, {transform_indices = @transform_6, window_bounds = array<i64: 128, 128>}, {transform_indices = @transform_7, window_bounds = array<i64: 1, 2, 8, 128>}]} {
    %c0_i32 = arith.constant 0 : i32
    %0 = arith.cmpi eq, %arg2, %c0_i32 : i32
    %1 = arith.extui %0 : i1 to i32
    %c0_i32_0 = arith.constant 0 : i32
    %2 = arith.cmpi ne, %1, %c0_i32_0 : i32
    scf.if %2 {
      %c0_11 = arith.constant 0 : index
      %c0_12 = arith.constant 0 : index
      %c0_13 = arith.constant 0 : index
      %14 = vector.load %arg3[%c0_11, %c0_12, %c0_13] : memref<1x8x128xf32, #tpu.memory_space<vmem>>, vector<1x8x128xf32>
      %15 = vector.shape_cast %14 : vector<1x8x128xf32> to vector<8x128xf32>
      %c0_14 = arith.constant 0 : index
      %c0_15 = arith.constant 0 : index
      %c0_16 = arith.constant 0 : index
      %16 = vector.load %arg4[%c0_14, %c0_15, %c0_16] : memref<1x8x128xf32, #tpu.memory_space<vmem>>, vector<1x8x128xf32>
      %17 = vector.shape_cast %16 : vector<1x8x128xf32> to vector<8x128xf32>
      %18 = tpu.concatenate %15, %17 in 1 : vector<8x128xf32>, vector<8x128xf32> -> vector<8x256xf32>
      %19 = arith.truncf %18 : vector<8x256xf32> to vector<8x256xbf16>
      %c0_17 = arith.constant 0 : index
      %c0_18 = arith.constant 0 : index
      %20 = vector.load %arg5[%c0_17, %c0_18] : memref<256x640xbf16, #tpu.memory_space<vmem>>, vector<256x640xbf16>
      %cst_19 = arith.constant dense<0.000000e+00> : vector<8x640xf32>
      %21 = tpu.matmul %19, %20, %cst_19 {dimension_numbers = #tpu.dot_dimension_numbers<[1], [0], [0], [1], [0, 0, 1, 1], [], []>} : vector<8x256xbf16>, vector<256x640xbf16>, vector<8x640xf32> -> vector<8x640xf32>
      %c0_20 = arith.constant 0 : index
      %c0_21 = arith.constant 0 : index
      %22 = vector.load %arg6[%c0_20, %c0_21] : memref<256x640xbf16, #tpu.memory_space<vmem>>, vector<256x640xbf16>
      %cst_22 = arith.constant dense<0.000000e+00> : vector<8x640xf32>
      %23 = tpu.matmul %19, %22, %cst_22 {dimension_numbers = #tpu.dot_dimension_numbers<[1], [0], [0], [1], [0, 0, 1, 1], [], []>} : vector<8x256xbf16>, vector<256x640xbf16>, vector<8x640xf32> -> vector<8x640xf32>
      %24 = arith.negf %21 : vector<8x640xf32>
      %25 = math.exp %24 : vector<8x640xf32>
      %cst_23 = arith.constant 1.000000e+00 : f32
      %26 = vector.broadcast %cst_23 : f32 to vector<8x640xf32>
      %27 = arith.addf %26, %25 : vector<8x640xf32>
      %28 = arith.divf %26, %27 : vector<8x640xf32>
      %29 = arith.mulf %21, %28 : vector<8x640xf32>
      %30 = arith.mulf %29, %23 : vector<8x640xf32>
      %31 = arith.truncf %30 : vector<8x640xf32> to vector<8x640xbf16>
      %c0_24 = arith.constant 0 : index
      %c0_25 = arith.constant 0 : index
      %32 = vector.load %arg7[%c0_24, %c0_25] : memref<640x256xbf16, #tpu.memory_space<vmem>>, vector<640x256xbf16>
      %cst_26 = arith.constant dense<0.000000e+00> : vector<8x256xf32>
      %33 = tpu.matmul %31, %32, %cst_26 {dimension_numbers = #tpu.dot_dimension_numbers<[1], [0], [0], [1], [0, 0, 1, 1], [], []>} : vector<8x640xbf16>, vector<640x256xbf16>, vector<8x256xf32> -> vector<8x256xf32>
      %34 = arith.addf %18, %33 : vector<8x256xf32>
      %cst_27 = arith.constant dense<0.000000e+00> : vector<8xf32>
      %35 = vector.multi_reduction <add>, %34, %cst_27 [1] : vector<8x256xf32> to vector<8xf32>
      %36 = vector.shape_cast %35 : vector<8xf32> to vector<8x1xf32>
      %cst_28 = arith.constant 2.560000e+02 : f32
      %37 = vector.broadcast %cst_28 : f32 to vector<8x1xf32>
      %38 = arith.divf %36, %37 : vector<8x1xf32>
      %39 = vector.broadcast %38 : vector<8x1xf32> to vector<8x256xf32>
      %40 = arith.subf %34, %39 : vector<8x256xf32>
      %41 = arith.mulf %40, %40 : vector<8x256xf32>
      %cst_29 = arith.constant dense<0.000000e+00> : vector<8xf32>
      %42 = vector.multi_reduction <add>, %41, %cst_29 [1] : vector<8x256xf32> to vector<8xf32>
      %43 = vector.shape_cast %42 : vector<8xf32> to vector<8x1xf32>
      %cst_30 = arith.constant 2.560000e+02 : f32
      %44 = vector.broadcast %cst_30 : f32 to vector<8x1xf32>
      %45 = arith.divf %43, %44 : vector<8x1xf32>
      %46 = vector.broadcast %38 : vector<8x1xf32> to vector<8x256xf32>
      %47 = arith.subf %34, %46 : vector<8x256xf32>
      %cst_31 = arith.constant 9.99999974E-6 : f32
      %48 = vector.broadcast %cst_31 : f32 to vector<8x1xf32>
      %49 = arith.addf %45, %48 : vector<8x1xf32>
      %50 = math.rsqrt %49 : vector<8x1xf32>
      %51 = vector.broadcast %50 : vector<8x1xf32> to vector<8x256xf32>
      %52 = arith.mulf %47, %51 : vector<8x256xf32>
      %c0_32 = arith.constant 0 : index
      %c0_33 = arith.constant 0 : index
      %53 = vector.load %arg8[%c0_32, %c0_33] : memref<1x256xf32, #tpu.memory_space<vmem>>, vector<1x256xf32>
      %54 = vector.broadcast %53 : vector<1x256xf32> to vector<8x256xf32>
      %55 = arith.mulf %52, %54 : vector<8x256xf32>
      %56 = vector.extract_strided_slice %55 {offsets = [0, 0], sizes = [8, 128], strides = [1, 1]} : vector<8x256xf32> to vector<8x128xf32>
      %57 = arith.truncf %56 : vector<8x128xf32> to vector<8x128xbf16>
      %c0_34 = arith.constant 0 : index
      %c0_35 = arith.constant 0 : index
      %58 = vector.load %arg11[%c0_34, %c0_35] : memref<16x128xbf16, #tpu.memory_space<vmem>>, vector<8x128xbf16>
      tpu.vector_store %arg11[%c0_34, %c0_35], %57 {strides = array<i32>} : memref<16x128xbf16, #tpu.memory_space<vmem>>, vector<8x128xbf16>,
      %59 = vector.extract_strided_slice %55 {offsets = [0, 128], sizes = [8, 128], strides = [1, 1]} : vector<8x256xf32> to vector<8x128xf32>
      %60 = arith.truncf %59 : vector<8x128xf32> to vector<8x128xbf16>
      %c8 = arith.constant 8 : index
      %c0_36 = arith.constant 0 : index
      %61 = vector.load %arg11[%c8, %c0_36] : memref<16x128xbf16, #tpu.memory_space<vmem>>, vector<8x128xbf16>
      tpu.vector_store %arg11[%c8, %c0_36], %60 {strides = array<i32>} : memref<16x128xbf16, #tpu.memory_space<vmem>>, vector<8x128xbf16>,
    } else {
    }
    %c0 = arith.constant 0 : index
    %c0_1 = arith.constant 0 : index
    %3 = vector.load %arg11[%c0, %c0_1] : memref<16x128xbf16, #tpu.memory_space<vmem>>, vector<16x128xbf16>
    %c0_2 = arith.constant 0 : index
    %c0_3 = arith.constant 0 : index
    %4 = vector.load %arg9[%c0_2, %c0_3] : memref<128x128xbf16, #tpu.memory_space<vmem>>, vector<128x128xbf16>
    %cst = arith.constant dense<0.000000e+00> : vector<16x128xf32>
    %5 = tpu.matmul %3, %4, %cst {dimension_numbers = #tpu.dot_dimension_numbers<[1], [0], [0], [1], [0, 0, 1, 1], [], []>} : vector<16x128xbf16>, vector<128x128xbf16>, vector<16x128xf32> -> vector<16x128xf32>
    %6 = vector.extract_strided_slice %5 {offsets = [0, 0], sizes = [8, 128], strides = [1, 1]} : vector<16x128xf32> to vector<8x128xf32>
    %c0_4 = arith.constant 0 : index
    %c0_5 = arith.constant 0 : index
    %c0_6 = arith.constant 0 : index
    %c0_7 = arith.constant 0 : index
    %7 = vector.load %arg10[%c0_4, %c0_5, %c0_6, %c0_7] : memref<1x2x8x128xf32, #tpu.memory_space<vmem>>, vector<1x1x8x128xf32>
    %8 = vector.shape_cast %7 : vector<1x1x8x128xf32> to vector<8x128xf32>
    %9 = vector.shape_cast %6 : vector<8x128xf32> to vector<1x1x8x128xf32>
    tpu.vector_store %arg10[%c0_4, %c0_5, %c0_6, %c0_7], %9 {strides = array<i32>} : memref<1x2x8x128xf32, #tpu.memory_space<vmem>>, vector<1x1x8x128xf32>,
    %10 = vector.extract_strided_slice %5 {offsets = [8, 0], sizes = [8, 128], strides = [1, 1]} : vector<16x128xf32> to vector<8x128xf32>
    %c0_8 = arith.constant 0 : index
    %c1 = arith.constant 1 : index
    %c0_9 = arith.constant 0 : index
    %c0_10 = arith.constant 0 : index
    %11 = vector.load %arg10[%c0_8, %c1, %c0_9, %c0_10] : memref<1x2x8x128xf32, #tpu.memory_space<vmem>>, vector<1x1x8x128xf32>
    %12 = vector.shape_cast %11 : vector<1x1x8x128xf32> to vector<8x128xf32>
    %13 = vector.shape_cast %10 : vector<8x128xf32> to vector<1x1x8x128xf32>
    tpu.vector_store %arg10[%c0_8, %c1, %c0_9, %c0_10], %13 {strides = array<i32>} : memref<1x2x8x128xf32, #tpu.memory_space<vmem>>, vector<1x1x8x128xf32>,
    return
  }
  func.func @transform_0(%arg0: i32, %arg1: i32, %arg2: i32) -> (i32, i32, i32) {
    %c0_i32 = arith.constant 0 : i32
    %c0_i32_0 = arith.constant 0 : i32
    return %arg0, %arg1, %c0_i32 : i32, i32, i32
  }
  func.func @transform_1(%arg0: i32, %arg1: i32, %arg2: i32) -> (i32, i32, i32) {
    %c0_i32 = arith.constant 0 : i32
    %c0_i32_0 = arith.constant 0 : i32
    return %arg0, %arg1, %c0_i32 : i32, i32, i32
  }
  func.func @transform_2(%arg0: i32, %arg1: i32, %arg2: i32) -> (i32, i32) {
    %c0_i32 = arith.constant 0 : i32
    %c0_i32_0 = arith.constant 0 : i32
    %c0_i32_1 = arith.constant 0 : i32
    return %c0_i32, %c0_i32_0 : i32, i32
  }
  func.func @transform_3(%arg0: i32, %arg1: i32, %arg2: i32) -> (i32, i32) {
    %c0_i32 = arith.constant 0 : i32
    %c0_i32_0 = arith.constant 0 : i32
    %c0_i32_1 = arith.constant 0 : i32
    return %c0_i32, %c0_i32_0 : i32, i32
  }
  func.func @transform_4(%arg0: i32, %arg1: i32, %arg2: i32) -> (i32, i32) {
    %c0_i32 = arith.constant 0 : i32
    %c0_i32_0 = arith.constant 0 : i32
    %c0_i32_1 = arith.constant 0 : i32
    return %c0_i32, %c0_i32_0 : i32, i32
  }
  func.func @transform_5(%arg0: i32, %arg1: i32, %arg2: i32) -> (i32, i32) {
    %c0_i32 = arith.constant 0 : i32
    %c0_i32_0 = arith.constant 0 : i32
    %c0_i32_1 = arith.constant 0 : i32
    return %c0_i32, %c0_i32_0 : i32, i32
  }
  func.func @transform_6(%arg0: i32, %arg1: i32, %arg2: i32) -> (i32, i32) {
    %c0_i32 = arith.constant 0 : i32
    %c0_i32_0 = arith.constant 0 : i32
    return %c0_i32, %arg2 : i32, i32
  }
  func.func @transform_7(%arg0: i32, %arg1: i32, %arg2: i32) -> (i32, i32, i32, i32) {
    %c0_i32 = arith.constant 0 : i32
    %c0_i32_0 = arith.constant 0 : i32
    return %arg0, %c0_i32, %arg1, %arg2 : i32, i32, i32, i32
  }
}

</mosaic_0001>

<bundles_post_ra>
// kernel: tpu_custom_call.1
= control target key start
LH: loop header
LB: loop body
LE: loop exit
PB: predicated region body
PF: predicated region fallthrough
CT: control target
= control target key end

     0   :  { %s4406_s0 = inlined_call_operand.hbm [shape: f32[2,8,128], index: 0, kind: input, shape index: {}]   ;;  %s4407_s1 = inlined_call_operand.hbm [shape: f32[2,8,128], index: 1, kind: input, shape index: {}]   ;;  %s4408_s2 = inlined_call_operand.hbm [shape: bf16[256,640], index: 2, kind: input, shape index: {}]   ;;  %s4409_s3 = inlined_call_operand.hbm [shape: bf16[256,640], index: 3, kind: input, shape index: {}]   ;;  %s4410_s4 = inlined_call_operand.hbm [shape: bf16[640,256], index: 4, kind: input, shape index: {}]   ;;  %s4411_s5 = inlined_call_operand.vmem [shape: f32[1,256], index: 5, kind: input, shape index: {}]   ;;  %s4412_s6 = inlined_call_operand.hbm [shape: bf16[128,256], index: 6, kind: input, shape index: {}]   ;;  %s4413_s7 = inlined_call_operand.hbm [shape: f32[2,2,8,256], index: 7, kind: output, shape index: {}]  }
   0x1   :  { %4431 = sst [smem:[#allocation32_spill]] %s4408_s2 }
   0x2   :  { %4432 = sst [smem:[#allocation33_spill]] %s4409_s3 }
   0x3   :  { %4433 = sst [smem:[#allocation34_spill]] %s4410_s4 }
   0x4   :  { %4434 = sst [smem:[#allocation35_spill]] %s4411_s5 }
   0x5   :  { %4435 = sst [smem:[#allocation36_spill]] %s4413_s7 }
   0x6   :  { %12 = vsyncpa [#allocation4], 0 }
   0x7   :  { %14 = vsyncpa [#allocation4 + $0x1], 0 }
   0x8   :  { %15 = vsyncpa [#allocation7], 0 }
   0x9   :  { %17 = vsyncpa [#allocation7 + $0x1], 0 }
   0xa   :  { %18 = vsyncpa [#allocation10], 0 }
   0xb   :  { %19 = vsyncpa [#allocation13], 0 }
   0xc   :  { %21 = vsyncpa [#allocation13 + $0x1], 0 }
   0xd   :  { %22 = vsyncpa [#allocation5], 0 }
   0xe   :  { %24 = vsyncpa [#allocation5 + $0x1], 0  ;;  %s4003_s24 = smov 0   ;;  %s4005_s25 = smov 0  }
   0xf   :  { %s4007_s26 = smov 0   ;;  %s4009_s27 = smov 0  }
  0x10   :  { %s4011_s28 = smov 0   ;;  %s4013_s29 = smov 0  }
  0x11   :  { %s4015_s30 = smov 0   ;;  %s4017_s8 = smov 0  }
  0x12   :  { %s4019_s9 = smov 0   ;;  %s4021_s10 = smov 0  }
  0x13   :  { %s4023_s11 = smov 0   ;;  %s4025_s12 = smov 0  }
  0x14   :  { %s4027_s13 = smov 0   ;;  %s4029_s14 = smov 0  }
  0x15 LB: > { %4436 = sst [smem:[#allocation21_spill]] %s3890_s24  ;;  %s4072_s15 = sadd.s32 4294967295, %s3942_s14   ;;  %s3942_s14 = sphi %s4029_s14, %s30_s14   ;;  %s3938_s13 = sphi %s4027_s13, %s4497_s13   ;;  %s3934_s12 = sphi %s4025_s12, %s4496_s12   ;;  %s3930_s11 = sphi %s4023_s11, %s4495_s11   ;;  %s3926_s10 = sphi %s4021_s10, %s4494_s10   ;;  %s3922_s9 = sphi %s4019_s9, %s4493_s9   ;;  %s3918_s8 = sphi %s4017_s8, %s4492_s8   ;;  %s3914_s30 = sphi %s4015_s30, %s4491_s30   ;;  %s3910_s29 = sphi %s4013_s29, %s4490_s29   ;;  %s3906_s28 = sphi %s4011_s28, %s4489_s28   ;;  %s3902_s27 = sphi %s4009_s27, %s4483_s27   ;;  %s3898_s26 = sphi %s4007_s26, %s4488_s26   ;;  %s3894_s25 = sphi %s4005_s25, %s4487_s25   ;;  %s3890_s24 = sphi %s4003_s24, %s4482_s24  }
  0x16   : > { %4437 = sst [smem:[#allocation22_spill]] %s3894_s25  ;;  %s2705_s16 = sadd.s32 4294967294, %s3942_s14  }
  0x17   : > { %4438 = sst [smem:[#allocation23_spill]] %s3906_s28  ;;  %p4419_p0 = scmp.eq.s32.totalorder %s4072_s15, 0 }
  0x18   : > { %4439 = sst [smem:[#allocation24_spill]] %s3926_s10  ;;  %p209_p1 = scmp.ne.s32.totalorder %s3906_s28, %s3902_s27 }
  0x19   : > { %4440 = sst [smem:[#allocation25_spill]] %s3930_s11  ;;  %p236_p2 = scmp.ne.s32.totalorder %s3898_s26, %s3894_s25 }
  0x1a   : > { %4441 = sst [smem:[#allocation26_spill]] %s4072_s15  ;;  %p237_p3 = scmp.eq.s32.totalorder %s4072_s15, 3 }
  0x1b   : > { %p4082_p4 = por %p209_p1, %p4419_p0  ;;  %p242_p5 = scmp.ne.s32.totalorder %s3894_s25, %s3890_s24 }
  0x1c   : > { %p4088_p6 = por %p237_p3, %p236_p2  ;;  %p243_p7 = scmp.eq.s32.totalorder %s2705_s16, 3 }
  0x1d   : > { %s4442_s17 = scalar_select %p4082_p4, 1, 0 }
  0x1e   : > { %s4444_s18 = scalar_select %p4088_p6, 1, 0 }
  0x1f   : > { %4443 = sst [smem:[#allocation27_spill]] %s4442_s17  ;;  %p2706_p8 = scmp.ge.s32.totalorder %s3942_s14, 1 }
  0x20   : > { %4445 = sst [smem:[#allocation28_spill]] %s4444_s18  ;;  %p250_p9 = scmp.lt.s32.totalorder %s3942_s14, 5 }
  0x21   : > { %p4094_p10 = por %p243_p7, %p242_p5  ;;  %s3944_s21 = smov [#allocation8]  }
  0x22   : > { %p4098_p11 = pnand %p2706_p8, %p250_p9  ;;  %s262_s22 = sshll.u32 %s3944_s21, 4  ;;  %s263_s22 = int_to_ptr.vmem [resolvable:$true] %s262_s22 }
  0x23   : > { %s4446_s19 = scalar_select %p4094_p10, 1, 0 }
  0x24   : > { %p3084_p12 = pneg %p4098_p11  ;;  %s3945_s27 = smov [#allocation9]  }
  0x25   : > { %4447 = sst [smem:[#allocation29_spill]] %s4446_s19  ;;  %s275_s16 = sshll.u32 %s3945_s27, 4  ;;  %s276_s16 = int_to_ptr.vmem [resolvable:$true] %s275_s16 }
  0x26   : > { %p4106_p13 = pnand %p3084_p12, %p4419_p0  ;;  %s3631_s19 = scalar_lea.vmem %s263_s22, 10240 }
  0x27   : > { %p3632_p2 = scmp.ne.s32.totalorder %s263_s22, %s3631_s19  ;;  %p3639_p7 = scmp.lt.s32.totalorder %s263_s22, %s263_s22 }
  0x28   : > { %p3622_p1 = pneg %p4106_p13  ;;  %p3640_p8 = scmp.lt.s32.totalorder %s3631_s19, %s3631_s19 }
  0x2a   : > { %p3634_p3 = pnand %p3632_p2, %p3622_p1  ;;  %p3641_p9 = por %p3640_p8, %p3639_p7 }
  0x2c   : > { %p3635_p5 = pneg %p3634_p3 }
  0x2e   : > { %p3642_p12 = pnand %p3641_p9, %p3635_p5 }
  0x30   : > { %3645 = shalt.err (!%p3642_p12)
}
  0x31   : > { %s3946_s21 = smov 320   ;;  %s3947_s24 = smov 20  }
  0x32   : > { %s4450_s2 = sld [smem:[#allocation32_spill]]  ;;  %s3657_s18 = scalar_lea.vmem %s276_s16, 10240 }
  0x33   : > { %p3658_p0 = scmp.ne.s32.totalorder %s276_s16, %s3657_s18  ;;  %p3665_p10 = scmp.lt.s32.totalorder %s276_s16, %s276_s16 }
  0x34   : > { %p3666_p6 = scmp.lt.s32.totalorder %s3657_s18, %s3657_s18 }
  0x35   : > { %p3660_p2 = pnand %p3658_p0, %p3622_p1 }
  0x36   : > { %p3667_p7 = por %p3666_p6, %p3665_p10 }
  0x37   : > { %p3661_p3 = pneg %p3660_p2 }
  0x38   : > { %3087 = dma.hbm_to_vmem [thread:$0]  (!%p4106_p13), %s4450_s2, 10240, %s263_s22, [#allocation7], %s3946_s21, %s3946_s21, %s3947_s24  }
  0x39   : > { %p3668_p5 = pnand %p3667_p7, %p3661_p3 }
  0x3b   : > { %3671 = shalt.err (!%p3668_p5)
}
  0x3c   : > { %s4451_s3 = sld [smem:[#allocation33_spill]]  ;;  %s3948_s7 = smov [#allocation11]  }
  0x3d   : > { %s288_s22 = sshll.u32 %s3948_s7, 4  ;;  %s289_s22 = int_to_ptr.vmem [resolvable:$true] %s288_s22 }
  0x3e   : > { %s3683_s27 = scalar_lea.vmem %s289_s22, 10240  ;;  %p3691_p12 = scmp.lt.s32.totalorder %s289_s22, %s289_s22 }
  0x3f   : > { %p3684_p8 = scmp.ne.s32.totalorder %s289_s22, %s3683_s27  ;;  %p3692_p6 = scmp.lt.s32.totalorder %s3683_s27, %s3683_s27 }
  0x41   : > { %p3686_p0 = pnand %p3684_p8, %p3622_p1  ;;  %p3693_p10 = por %p3692_p6, %p3691_p12 }
  0x42   : > { %3090 = dma.hbm_to_vmem [thread:$0]  (!%p4106_p13), %s4451_s3, 10240, %s276_s16, [#allocation10], %s3946_s21, %s3946_s21, %s3947_s24  }
  0x43   : > { %p3687_p9 = pneg %p3686_p0 }
  0x45   : > { %p3694_p2 = pnand %p3693_p10, %p3687_p9 }
  0x47   : > { %3697 = shalt.err (!%p3694_p2)
}
  0x48   : > { %s4421_s18 = smov 128   ;;  %s3950_s24 = smov 8  }
  0x49   : > { %s4452_s4 = sld [smem:[#allocation34_spill]]  ;;  %s42_s21 = sadd.s32 1, %s3934_s12 }
  0x4a   : > { %s49_s19 = sadd.s32 1, %s3938_s13  ;;  %p43_p1 = scmp.ge.s32.totalorder %s42_s21, 2 }
  0x4b   : > { %s58_s7 = sadd.s32 1, %s3922_s9  ;;  %p65_p3 = scmp.ne.s32.totalorder %s3922_s9, %s3918_s8 }
  0x4c   : > { %p66_p7 = scmp.eq.s32.totalorder %s3942_s14, 0  ;;  %s4499_s21 = smov (%p43_p1, %s42_s21), 0 }
  0x4d   : > { %4453 = sst [smem:[#allocation30_spill]] %s4499_s21  ;;  %s4501_s19 = smov (!%p43_p1, %s49_s19), %s3938_s13 }
  0x4e   : > { %p71_p5 = scmp.ne.s32.totalorder %s3918_s8, %s3914_s30  ;;  %p51_p8 = scmp.ge.s32.totalorder %s4501_s19, 2 }
  0x4f   : > { %3093 = dma.hbm_to_vmem [thread:$0]  (!%p4106_p13), %s4452_s4, 10240, %s289_s22, [#allocation10], %s4421_s18, %s4421_s18, %s3950_s24  }
  0x50   : > { %p4149_p13 = por %p66_p7, %p65_p3  ;;  %s193_s22 = ssub.s32 %s3934_s12, %s4499_s21 }
  0x51   : > { %p4455_p0 = scmp.eq.s32.totalorder %s4072_s15, 0  ;;  %p194_p12 = scmp.eq.s32.totalorder %s193_s22, 0 }
  0x52   : > { %s4503_s19 = smov (%p51_p8, %s4501_s19), 0  ;;  %s196_s24 = sadd.s32 1, %s3910_s29 }
  0x53   : > { %p4159_p9 = por %p4455_p0, %p71_p5  ;;  %4457 = sst [smem:[#allocation31_spill]] %s4503_s19 }
  0x54   : > { %p203_p6 = scmp.ne.s32.totalorder %s3910_s29, %s3906_s28  ;;  %s53_s11 = ssub.s32 %s3938_s13, %s4503_s19 }
  0x55   : > { %s226_s16 = sadd.s32 1, %s3898_s26  ;;  %p56_p10 = scmp.eq.s32.totalorder %s53_s11, 0 }
  0x56   : > { %p4173_p2 = por %p203_p6, %p66_p7  ;;  %s223_s3 = sor.u32 %s193_s22, %s53_s11 }
  0x57   : > { %s4178_s18 = scalar_select %p194_p12, %s3910_s29, %s196_s24  }
  0x58   : > { %s4181_s2 = scalar_select %p56_p10, %s3922_s9, %s58_s7  }
  0x59   : > { %p3111_p1 = scmp.lt.s32.totalorder %s3942_s14, 4  ;;  %p224_p3 = scmp.eq.s32.totalorder %s223_s3, 0 }
  0x5a   : > { %s305_s4 = sand.u32 1, %s3922_s9   ;;  %s2712_s19 = sshll.u32 %s3938_s13, 7 }
  0x5b   : > { %s2711_s21 = sshll.u32 %s305_s4, 3  ;;  %s315_s17 = scalar_lea.hbm %s4406_s0, %s2712_s19 }
  0x5c   : > { %s4186_s5 = scalar_select %p224_p3, %s3898_s26, %s226_s16  }
  0x5d   : > { %s309_s28 = scalar_lea.vmem [#allocation3], %s2711_s21  ;;  %p4194_p7 = pnand %p3111_p1, %p4149_p13 }
  0x5e   : > { %s317_s15 = sshll.u32 %s309_s28, 4  ;;  %s4201_s3 = scalar_lea.hbm %s4407_s1, %s2712_s19  ;;  %s318_s15 = int_to_ptr.vmem [resolvable:$true] %s317_s15 }
  0x5f   : > { %p4205_p5 = pnand %p3111_p1, %p4173_p2  ;;  %s306_s25 = scalar_lea.sflag [#allocation4], %s305_s4 }
  0x60   : > { %p3700_p8 = pneg %p4194_p7  ;;  %s3711_s28 = scalar_lea.vmem %s318_s15, 128 }
  0x61   : > { %p3712_p13 = scmp.ne.s32.totalorder %s318_s15, %s3711_s28  ;;  %s3951_s10 = smov [#allocation3]  }
  0x62   : > { %s3716_s23 = sshll.u32 %s3951_s10, 4  ;;  %s3717_s23 = int_to_ptr.vmem [resolvable:$false] %s3716_s23 }
  0x63   : > { %p3714_p0 = pnand %p3712_p13, %p3700_p8  ;;  %s3718_s16 = scalar_lea.vmem %s3717_s23, 256 }
  0x64   : > { %p3719_p6 = scmp.lt.s32.totalorder %s318_s15, %s3717_s23  ;;  %p3720_p10 = scmp.lt.s32.totalorder %s3718_s16, %s3711_s28 }
  0x65   : > { %p3715_p12 = pneg %p3714_p0 }
  0x66   : > { %p3721_p3 = por %p3720_p10, %p3719_p6 }
  0x68   : > { %p3722_p2 = pnand %p3721_p3, %p3715_p12 }
  0x6a   : > { %3725 = shalt.err (!%p3722_p2)
}
  0x6b   : > { %3097 = dma.hbm_to_vmem [thread:$0]  (!%p4194_p7), %s315_s17, 128, %s318_s15, %s306_s25  }
  0x6c   : > { %s324_s4 = sand.u32 1, %s3942_s14   ;;  %s328_s19 = scalar_lea.vmem [#allocation6], %s2711_s21 }
  0x6d   : > { %s336_s30 = sshll.u32 %s328_s19, 4  ;;  %s343_s7 = sand.u32 1, %s3910_s29   ;;  %s337_s30 = int_to_ptr.vmem [resolvable:$true] %s336_s30 }
  0x6e   : > { %s325_s22 = scalar_lea.sflag [#allocation7], %s324_s4  ;;  %s3739_s10 = scalar_lea.vmem %s337_s30, 128 }
  0x6f   : > { %p3740_p1 = scmp.ne.s32.totalorder %s337_s30, %s3739_s10  ;;  %s3952_s28 = smov [#allocation6]  }
  0x70   : > { %s3744_s23 = sshll.u32 %s3952_s28, 4  ;;  %s3745_s23 = int_to_ptr.vmem [resolvable:$false] %s3744_s23 }
  0x71   : > { %p3742_p13 = pnand %p3740_p1, %p3700_p8  ;;  %s3746_s16 = scalar_lea.vmem %s3745_s23, 256 }
  0x72   : > { %p3747_p12 = scmp.lt.s32.totalorder %s337_s30, %s3745_s23  ;;  %p3748_p6 = scmp.lt.s32.totalorder %s3746_s16, %s3739_s10 }
  0x73   : > { %p3743_p0 = pneg %p3742_p13 }
  0x74   : > { %p3749_p10 = por %p3748_p6, %p3747_p12 }
  0x76   : > { %p3750_p3 = pnand %p3749_p10, %p3743_p0 }
  0x78   : > { %3753 = shalt.err (!%p3750_p3)
}
  0x79   : > { %3100 = dma.hbm_to_vmem [thread:$0]  (!%p4194_p7), %s4201_s3, 128, %s337_s30, %s325_s22  }
  0x7a   : > { %s2715_s15 = sshll.u32 %s343_s7, 6  ;;  %s2716_s17 = sshll.u32 %s3934_s12, 6 }
  0x7b   : > { %s352_s4 = scalar_lea.hbm %s4412_s6, %s2716_s17  ;;  %s347_s19 = scalar_lea.vmem [#allocation12], %s2715_s15 }
  0x7c   : > { %s353_s28 = sshll.u32 %s347_s19, 4  ;;  %s344_s23 = scalar_lea.sflag [#allocation13], %s343_s7  ;;  %s354_s28 = int_to_ptr.vmem [resolvable:$true] %s353_s28 }
  0x7d   : > { %p3756_p8 = pneg %p4205_p5  ;;  %s3767_s10 = scalar_lea.vmem %s354_s28, 1024 }
  0x7e   : > { %p3768_p2 = scmp.ne.s32.totalorder %s354_s28, %s3767_s10  ;;  %s3953_s24 = smov [#allocation12]  }
  0x7f   : > { %s3772_s16 = sshll.u32 %s3953_s24, 4  ;;  %s3773_s16 = int_to_ptr.vmem [resolvable:$false] %s3772_s16 }
  0x80   : > { %p3770_p1 = pnand %p3768_p2, %p3756_p8  ;;  %s3774_s3 = scalar_lea.vmem %s3773_s16, 2048 }
  0x81   : > { %p3775_p7 = scmp.lt.s32.totalorder %s354_s28, %s3773_s16  ;;  %p3776_p0 = scmp.lt.s32.totalorder %s3774_s3, %s3767_s10 }
  0x82   : > { %p3771_p13 = pneg %p3770_p1 }
  0x83   : > { %p3777_p12 = por %p3776_p0, %p3775_p7 }
  0x85   : > { %p3778_p6 = pnand %p3777_p12, %p3771_p13 }
  0x87   : > { %3781 = shalt.err (!%p3778_p6)
}
  0x88   : > { %s3954_s30 = smov 64   ;;  %s3955_s22 = smov 4  }
  0x89   : > { %s4461_s7 = smov 128   ;;  %365 = sbr.rel (%p4098_p11) target bundleno = 1302 (0x516), region = 48 }
  0x8a   : > { %3103 = dma.hbm_to_vmem [thread:$0]  (!%p4205_p5), %s352_s4, 1024, %s354_s28, %s344_s23, %s4461_s7, %s3954_s30, %s3955_s22  }
  0x8b   : > { %s367_s15 = sand.u32 (!%p4098_p11), 1, %s3918_s8  }
  0x8c   : > { %s4236_s17 = sshll.u32 (!%p4098_p11), %s367_s15, 3  ;;  %s368_s21 = scalar_lea.sflag (!%p4098_p11), [#allocation4], %s367_s15 }
  0x8d   : > { %s371_s25 = scalar_lea.vmem (!%p4098_p11), [#allocation3], %s4236_s17 }
  0x8e   : > { %3865 = dma.done.wait (%p4159_p9), %s368_s21, 128  }
  0x8f   : > { %3867 = vsyncadd (%p4159_p9), %s368_s21, 4294967168  ;;  %s4462_s19 = sld [smem:[#allocation26_spill]]  ;;  %s380_s20 = scalar_lea.vmem [#allocation6], %s4236_s17 }
  0x95   : > { %s376_s11 = sand.u32 1, %s4462_s19  }
  0x96   : > { %s377_s4 = scalar_lea.sflag [#allocation7], %s376_s11 }
  0x97   : > { %3869 = dma.done.wait (%p4159_p9), %s377_s4, 128  }
  0x98   : > { %3871 = vsyncadd (%p4159_p9), %s377_s4, 4294967168  ;;  %p4463_p11 = scmp.eq.s32.totalorder %s4462_s19, 0 }
  0x9a   : > { %3873 = dma.done.wait (%p4463_p11), [#allocation7], 10240   ;;  %p4464_p5 = pmov %p4463_p11 }
  0x9c   : > { %3875 = vsyncadd (%p4464_p5), [#allocation7], 4294957056  ;;  %p4465_p10 = pmov %p4464_p5 }
  0x9d   : > { %p4466_p3 = pmov %p4464_p5 }
  0x9e   : > { %3877 = dma.done.wait (%p4465_p10), [#allocation10], 20480  }
  0x9f   : > { %3879 = vsyncadd (%p4466_p3), [#allocation10], 4294946816  ;;  %s4467_s28 = sld [smem:[#allocation23_spill]] }
  0xa5   : > { %s397_s10 = sand.u32 1, %s4467_s28  }
  0xa6   : > { %s2723_s24 = sshll.u32 %s397_s10, 6  ;;  %s398_s16 = scalar_lea.sflag [#allocation13], %s397_s10 }
  0xa7   : > { %s4258_s3 = scalar_lea.vmem [#allocation12], %s2723_s24 }
  0xa8   : > { %3881 = dma.done.wait (%p4082_p4), %s398_s16, 1024  }
  0xa9   : > { %3883 = vsyncadd (%p4082_p4), %s398_s16, 4294966272  ;;  %s4469_s27 = sld [smem:[#allocation22_spill]] }
  0xaa   : > { %s4470_s15 = sld [smem:[#allocation24_spill]] }
  0xaf   : > { %s439_s30 = sand.u32 1, %s4469_s27  }
  0xb0   : > { %s2724_s22 = sshll.u32 %s439_s30, 4  ;;  %p2725_p9 = scmp.ne.s32.totalorder %s4470_s15, 0 }
  0xb1   : > { %s4267_s7 = scalar_lea.vmem [#allocation14], %s2724_s22 }
  0xb2   : > { %446 = sbr.rel (%p2725_p9) target bundleno = 1056 (0x420), region = 76 }
  0xb7   : > { %v3243_v0 = vld [vmem:[#allocation8 + $0x11c] ss:$20 sps:$4 sm:$0xff]   ;;  %v3245_v1 = vld [vmem:[#allocation8 + $0x124] ss:$20 sps:$4 sm:$0xff]   ;;  %v3248_v3 = vld [vmem:[#allocation8 + $0x120] ss:$20 sps:$4 sm:$0xff]  }
  0xb8   : > { %963 = vmatprep.subr.bf16.mxu0 %v3243_v0  ;;  %v3247_v2 = vld [vmem:[#allocation8 + $0x118] ss:$20 sps:$4 sm:$0xff]   ;;  %1004 = vmatprep.subr.bf16.mxu1 %v3245_v1  ;;  %v3249_v4 = vld [vmem:[#allocation8 + $0xf4] ss:$20 sps:$4 sm:$0xff]   ;;  %v3251_v5 = vld [vmem:[#allocation8 + $0xfc] ss:$20 sps:$4 sm:$0xff]  }
  0xb9   : > { %964 = vmatpush1.bf16.msra.mxu0 %v3247_v2  ;;  %1005 = vmatpush1.bf16.msra.mxu1 %v3248_v3  ;;  %v3253_v6 = vld [vmem:[#allocation8 + $0xf0] ss:$20 sps:$4 sm:$0xff]   ;;  %v3254_v7 = vld [vmem:[#allocation8 + $0xf8] ss:$20 sps:$4 sm:$0xff]   ;;  %v3257_v9 = vld [vmem:[#allocation8 + $0xd4] ss:$20 sps:$4 sm:$0xff]  }
  0xba   : > { %965 = vmatprep.subr.bf16.mxu0 %v3249_v4  ;;  %1006 = vmatprep.subr.bf16.mxu1 %v3251_v5  ;;  %v3255_v8 = vld [vmem:[#allocation8 + $0xcc] ss:$20 sps:$4 sm:$0xff]   ;;  %v3259_v10 = vld [vmem:[#allocation8 + $0xc8] ss:$20 sps:$4 sm:$0xff]   ;;  %v3260_v11 = vld [vmem:[#allocation8 + $0xd0] ss:$20 sps:$4 sm:$0xff]  }
  0xbb   : > { %v3261_v12 = vld [vmem:[#allocation8 + $0xa4] ss:$20 sps:$4 sm:$0xff]   ;;  %v3263_v13 = vld [vmem:[#allocation8 + $0xac] ss:$20 sps:$4 sm:$0xff]   ;;  %v3266_v15 = vld [vmem:[#allocation8 + $0xa8] ss:$20 sps:$4 sm:$0xff]  }
  0xbc   : > { %v3265_v14 = vld [vmem:[#allocation8 + $0xa0] ss:$20 sps:$4 sm:$0xff]   ;;  %v3267_v16 = vld [vmem:[#allocation8 + $0x7c] ss:$20 sps:$4 sm:$0xff]   ;;  %v3269_v17 = vld [vmem:[#allocation8 + $0x84] ss:$20 sps:$4 sm:$0xff]  }
  0xbd   : > { %966 = vmatpush1.bf16.msra.mxu0 %v3253_v6  ;;  %1007 = vmatpush1.bf16.msra.mxu1 %v3254_v7  ;;  %v3271_v18 = vld [vmem:[#allocation8 + $0x78] ss:$20 sps:$4 sm:$0xff]   ;;  %v3272_v19 = vld [vmem:[#allocation8 + $0x80] ss:$20 sps:$4 sm:$0xff]   ;;  %v3275_v21 = vld [vmem:[#allocation8 + $0x5c] ss:$20 sps:$4 sm:$0xff]  }
  0xbe   : > { %967 = vmatprep.subr.bf16.mxu0 %v3255_v8  ;;  %1008 = vmatprep.subr.bf16.mxu1 %v3257_v9  ;;  %v3273_v20 = vld [vmem:[#allocation8 + $0x54] ss:$20 sps:$4 sm:$0xff]   ;;  %v3277_v22 = vld [vmem:[#allocation8 + $0x50] ss:$20 sps:$4 sm:$0xff]   ;;  %v3278_v23 = vld [vmem:[#allocation8 + $0x58] ss:$20 sps:$4 sm:$0xff]  }
  0xbf   : > { %v3279_v24 = vld [vmem:[#allocation8 + $0x2c] ss:$20 sps:$4 sm:$0xff]   ;;  %v3281_v25 = vld [vmem:[#allocation8 + $0x34] ss:$20 sps:$4 sm:$0xff]   ;;  %v3284_v27 = vld [vmem:[#allocation8 + $0x30] ss:$20 sps:$4 sm:$0xff]  }
  0xc0   : > { %v3283_v26 = vld [vmem:[#allocation8 + $0x28] ss:$20 sps:$4 sm:$0xff]   ;;  %v3285_v28 = vld [vmem:[#allocation8 + $0x4] ss:$20 sps:$4 sm:$0xff]   ;;  %v3287_v29 = vld [vmem:[#allocation8 + $0xc] ss:$20 sps:$4 sm:$0xff]  }
  0xc1   : > { %968 = vmatpush1.bf16.msra.mxu0 %v3259_v10  ;;  %1009 = vmatpush1.bf16.msra.mxu1 %v3260_v11  ;;  %v3289_v30 = vld [vmem:[#allocation8] ss:$20 sps:$4 sm:$0xff]   ;;  %v3290_v31 = vld [vmem:[#allocation8 + $0x8] ss:$20 sps:$4 sm:$0xff]   ;;  %v3293_v33 = vld [vmem:[#allocation8 + $0x264] ss:$20 sps:$4 sm:$0xff]  }
  0xc2   : > { %969 = vmatprep.subr.bf16.mxu0 %v3261_v12  ;;  %1010 = vmatprep.subr.bf16.mxu1 %v3263_v13  ;;  %v3291_v32 = vld [vmem:[#allocation8 + $0x25c] ss:$20 sps:$4 sm:$0xff]   ;;  %v3295_v34 = vld [vmem:[#allocation8 + $0x258] ss:$20 sps:$4 sm:$0xff]   ;;  %v3296_v35 = vld [vmem:[#allocation8 + $0x260] ss:$20 sps:$4 sm:$0xff]  }
  0xc3   : > { %v3297_v36 = vld [vmem:[#allocation8 + $0x234] ss:$20 sps:$4 sm:$0xff]   ;;  %v3299_v37 = vld [vmem:[#allocation8 + $0x23c] ss:$20 sps:$4 sm:$0xff]   ;;  %v3302_v39 = vld [vmem:[#allocation8 + $0x238] ss:$20 sps:$4 sm:$0xff]  }
  0xc4   : > { %v3301_v38 = vld [vmem:[#allocation8 + $0x230] ss:$20 sps:$4 sm:$0xff]   ;;  %v3303_v40 = vld [vmem:[#allocation8 + $0x20c] ss:$20 sps:$4 sm:$0xff]   ;;  %v3305_v41 = vld [vmem:[#allocation8 + $0x214] ss:$20 sps:$4 sm:$0xff]  }
  0xc5   : > { %970 = vmatpush1.bf16.msra.mxu0 %v3265_v14  ;;  %1011 = vmatpush1.bf16.msra.mxu1 %v3266_v15  ;;  %v3307_v42 = vld [vmem:[#allocation8 + $0x208] ss:$20 sps:$4 sm:$0xff]   ;;  %v3308_v43 = vld [vmem:[#allocation8 + $0x210] ss:$20 sps:$4 sm:$0xff]   ;;  %v3311_v45 = vld [vmem:[#allocation8 + $0x1ec] ss:$20 sps:$4 sm:$0xff]  }
  0xc6   : > { %971 = vmatprep.subr.bf16.mxu0 %v3267_v16  ;;  %1012 = vmatprep.subr.bf16.mxu1 %v3269_v17  ;;  %v3309_v44 = vld [vmem:[#allocation8 + $0x1e4] ss:$20 sps:$4 sm:$0xff]   ;;  %v3313_v47 = vld [vmem:[#allocation8 + $0x1e0] ss:$20 sps:$4 sm:$0xff]   ;;  %v3314_v49 = vld [vmem:[#allocation8 + $0x1e8] ss:$20 sps:$4 sm:$0xff]  }
  0xc7   : > { %v448_v46 = vld [vmem:[%s380_s20] sm:$0xff]  ;;  %v3327_v58 = vld [vmem:[#allocation8 + $0x16c] ss:$20 sps:$4 sm:$0xff]  }
  0xc8   : > { %v4272_v48 = vpack.c.bf16 %v448_v46, %v448_v46  ;;  %v3315_v50 = vld [vmem:[#allocation8 + $0x1bc] ss:$20 sps:$4 sm:$0xff]   ;;  %v3317_v51 = vld [vmem:[#allocation8 + $0x1c4] ss:$20 sps:$4 sm:$0xff]   ;;  %v3320_v53 = vld [vmem:[#allocation8 + $0x1c0] ss:$20 sps:$4 sm:$0xff]  }
  0xc9   : > { %972 = vmatpush1.bf16.msra.mxu0 %v3271_v18  ;;  %1013 = vmatpush1.bf16.msra.mxu1 %v3272_v19  ;;  %v3319_v52 = vld [vmem:[#allocation8 + $0x1b8] ss:$20 sps:$4 sm:$0xff]   ;;  %v3321_v54 = vld [vmem:[#allocation8 + $0x194] ss:$20 sps:$4 sm:$0xff]   ;;  %v3323_v55 = vld [vmem:[#allocation8 + $0x19c] ss:$20 sps:$4 sm:$0xff]  }
  0xca   : > { %973 = vmatprep.subr.bf16.mxu0 %v3273_v20  ;;  %1014 = vmatprep.subr.bf16.mxu1 %v3275_v21  ;;  %v3325_v56 = vld [vmem:[#allocation8 + $0x190] ss:$20 sps:$4 sm:$0xff]   ;;  %v3326_v57 = vld [vmem:[#allocation8 + $0x198] ss:$20 sps:$4 sm:$0xff]   ;;  %v3329_v59 = vld [vmem:[#allocation8 + $0x174] ss:$20 sps:$4 sm:$0xff]  }
  0xcb   : > { %995 = vmatprep.mubr.bf16.mxu0 %v4272_v48  ;;  %1036 = vmatprep.mubr.bf16.mxu1 %v4272_v48  ;;  %v3331_v60 = vld [vmem:[#allocation8 + $0x168] ss:$20 sps:$4 sm:$0xff]   ;;  %v3332_v61 = vld [vmem:[#allocation8 + $0x170] ss:$20 sps:$4 sm:$0xff]   ;;  %v3335_v63 = vld [vmem:[#allocation8 + $0x14c] ss:$20 sps:$4 sm:$0xff]  }
  0xcc   : > { %v3333_v62 = vld [vmem:[#allocation8 + $0x144] ss:$20 sps:$4 sm:$0xff]   ;;  %v3337_v0 = vld [vmem:[#allocation8 + $0x140] ss:$20 sps:$4 sm:$0xff]   ;;  %v3338_v1 = vld [vmem:[#allocation8 + $0x148] ss:$20 sps:$4 sm:$0xff]  }
  0xcd   : > { %974 = vmatpush1.bf16.msra.mxu0 %v3277_v22  ;;  %1015 = vmatpush1.bf16.msra.mxu1 %v3278_v23  ;;  %v447_v2 = vld [vmem:[%s371_s25] sm:$0xff]  ;;  %v3342_v4 = vld [vmem:[#allocation9 + $0x11c] ss:$20 sps:$4 sm:$0xff]  }
  0xce   : > { %975 = vmatprep.subr.bf16.mxu0 %v3279_v24  ;;  %1016 = vmatprep.subr.bf16.mxu1 %v3281_v25  ;;  %v3339_v3 = vld [vmem:[#allocation8 + $0x268] ss:$20 sps:$4 sm:$0xff]   ;;  %v4278_v5 = vpack.c.bf16 %v447_v2, %v447_v2  ;;  %v3340_v6 = vld [vmem:[#allocation9 + $0x118] ss:$20 sps:$4 sm:$0xff]   ;;  %v3344_v8 = vld [vmem:[#allocation8 + $0x240] ss:$20 sps:$4 sm:$0xff]  }
  0xcf   : > { %v3343_v7 = vld [vmem:[#allocation8 + $0x128] ss:$20 sps:$4 sm:$0xff]   ;;  %v3345_v10 = vld [vmem:[#allocation9 + $0xf0] ss:$20 sps:$4 sm:$0xff]   ;;  %v3348_v11 = vld [vmem:[#allocation8 + $0x100] ss:$20 sps:$4 sm:$0xff]  }
  0xd0   : > { %v3347_v9 = vld [vmem:[#allocation9 + $0xf4] ss:$20 sps:$4 sm:$0xff]   ;;  %v3349_v12 = vld [vmem:[#allocation8 + $0x218] ss:$20 sps:$4 sm:$0xff]   ;;  %v3354_v16 = vld [vmem:[#allocation8 + $0x1f0] ss:$20 sps:$4 sm:$0xff]  }
  0xd1   : > { %976 = vmatpush1.bf16.msra.mxu0 %v3283_v26  ;;  %1017 = vmatpush1.bf16.msra.mxu1 %v3284_v27  ;;  %v3352_v13 = vld [vmem:[#allocation9 + $0xcc] ss:$20 sps:$4 sm:$0xff]   ;;  %v3350_v14 = vld [vmem:[#allocation9 + $0xc8] ss:$20 sps:$4 sm:$0xff]   ;;  %v3357_v17 = vld [vmem:[#allocation9 + $0xa4] ss:$20 sps:$4 sm:$0xff]  }
  0xd2   : > { %977 = vmatprep.subr.bf16.mxu0 %v3285_v28  ;;  %1018 = vmatprep.subr.bf16.mxu1 %v3287_v29  ;;  %v3353_v15 = vld [vmem:[#allocation8 + $0xd8] ss:$20 sps:$4 sm:$0xff]   ;;  %v3355_v18 = vld [vmem:[#allocation9 + $0xa0] ss:$20 sps:$4 sm:$0xff]   ;;  %v3358_v19 = vld [vmem:[#allocation8 + $0xb0] ss:$20 sps:$4 sm:$0xff]  }
  0xd3   : > { %v3359_v20 = vld [vmem:[#allocation8 + $0x1c8] ss:$20 sps:$4 sm:$0xff]   ;;  %v3360_v22 = vld [vmem:[#allocation9 + $0x78] ss:$20 sps:$4 sm:$0xff]   ;;  %v3364_v24 = vld [vmem:[#allocation8 + $0x1a0] ss:$20 sps:$4 sm:$0xff]  }
  0xd4   : > { %v3362_v21 = vld [vmem:[#allocation9 + $0x7c] ss:$20 sps:$4 sm:$0xff]   ;;  %v3367_v25 = vld [vmem:[#allocation9 + $0x54] ss:$20 sps:$4 sm:$0xff]   ;;  %v3369_v28 = vld [vmem:[#allocation8 + $0x178] ss:$20 sps:$4 sm:$0xff]  }
  0xd5   : > { %978 = vmatpush1.bf16.msra.mxu0 %v3289_v30  ;;  %1019 = vmatpush1.bf16.msra.mxu1 %v3290_v31  ;;  %v3363_v23 = vld [vmem:[#allocation8 + $0x88] ss:$20 sps:$4 sm:$0xff]   ;;  %v3365_v26 = vld [vmem:[#allocation9 + $0x50] ss:$20 sps:$4 sm:$0xff]   ;;  %v3368_v27 = vld [vmem:[#allocation8 + $0x60] ss:$20 sps:$4 sm:$0xff]  }
  0xd6   : > { %979 = vmatprep.subr.bf16.mxu0 %v3291_v32  ;;  %1020 = vmatprep.subr.bf16.mxu1 %v3293_v33  ;;  %v3372_v29 = vld [vmem:[#allocation9 + $0x2c] ss:$20 sps:$4 sm:$0xff]   ;;  %v3370_v30 = vld [vmem:[#allocation9 + $0x28] ss:$20 sps:$4 sm:$0xff]   ;;  %v3374_v32 = vld [vmem:[#allocation8 + $0x150] ss:$20 sps:$4 sm:$0xff]  }
  0xd7   : > { %v3373_v31 = vld [vmem:[#allocation8 + $0x38] ss:$20 sps:$4 sm:$0xff]   ;;  %v3391_v46 = vld [vmem:[#allocation9 + $0x208] ss:$20 sps:$4 sm:$0xff]  }
  0xd8   : > { %v3377_v33 = vld [vmem:[#allocation9 + $0x4] ss:$20 sps:$4 sm:$0xff]   ;;  %v3426_v2 = vld [vmem:[#allocation9 + $0xc] ss:$20 sps:$4 sm:$0xff]  }
  0xd9   : > { %980 = vmatpush2.bf16.msra.mxu0 %v3295_v34  ;;  %1021 = vmatpush2.bf16.msra.mxu1 %v3296_v35  ;;  %v3375_v34 = vld [vmem:[#allocation9] ss:$20 sps:$4 sm:$0xff]   ;;  %v3378_v35 = vld [vmem:[#allocation8 + $0x10] ss:$20 sps:$4 sm:$0xff]  }
  0xda   : > { %981 = vmatprep.subr.bf16.mxu0 %v3297_v36  ;;  %1022 = vmatprep.subr.bf16.mxu1 %v3299_v37  ;;  %v3381_v36 = vld [vmem:[#allocation9 + $0x25c] ss:$20 sps:$4 sm:$0xff]   ;;  %v3384_v37 = vld [vmem:[#allocation9 + $0x124] ss:$20 sps:$4 sm:$0xff]  }
  0xdd   : > { %982 = vmatpush2.bf16.msra.mxu0 %v3301_v38  ;;  %1023 = vmatpush2.bf16.msra.mxu1 %v3302_v39  ;;  %v3379_v38 = vld [vmem:[#allocation9 + $0x258] ss:$20 sps:$4 sm:$0xff]   ;;  %v3382_v39 = vld [vmem:[#allocation9 + $0x120] ss:$20 sps:$4 sm:$0xff]  }
  0xde   : > { %983 = vmatprep.subr.bf16.mxu0 %v3303_v40  ;;  %1024 = vmatprep.subr.bf16.mxu1 %v3305_v41  ;;  %v3387_v40 = vld [vmem:[#allocation9 + $0x234] ss:$20 sps:$4 sm:$0xff]   ;;  %v3390_v41 = vld [vmem:[#allocation9 + $0xfc] ss:$20 sps:$4 sm:$0xff]  }
  0xe1   : > { %984 = vmatpush2.bf16.msra.mxu0 %v3307_v42  ;;  %1025 = vmatpush2.bf16.msra.mxu1 %v3308_v43  ;;  %v3385_v42 = vld [vmem:[#allocation9 + $0x230] ss:$20 sps:$4 sm:$0xff]   ;;  %v3388_v43 = vld [vmem:[#allocation9 + $0xf8] ss:$20 sps:$4 sm:$0xff]  }
  0xe2   : > { %985 = vmatprep.subr.bf16.mxu0 %v3309_v44  ;;  %1026 = vmatprep.subr.bf16.mxu1 %v3311_v45  ;;  %v3393_v44 = vld [vmem:[#allocation9 + $0x20c] ss:$20 sps:$4 sm:$0xff]   ;;  %v3396_v45 = vld [vmem:[#allocation9 + $0xd4] ss:$20 sps:$4 sm:$0xff]  }
  0xe5   : > { %986 = vmatpush2.bf16.msra.mxu0 %v3313_v47  ;;  %1027 = vmatpush2.bf16.msra.mxu1 %v3314_v49  ;;  %v3394_v47 = vld [vmem:[#allocation9 + $0xd0] ss:$20 sps:$4 sm:$0xff]  }
  0xe6   : > { %987 = vmatprep.subr.bf16.mxu0 %v3315_v50  ;;  %1028 = vmatprep.subr.bf16.mxu1 %v3317_v51  ;;  %v3399_v49 = vld [vmem:[#allocation9 + $0x1e4] ss:$20 sps:$4 sm:$0xff]   ;;  %v3402_v50 = vld [vmem:[#allocation9 + $0xac] ss:$20 sps:$4 sm:$0xff]  }
  0xe7   : > { %v3397_v51 = vld [vmem:[#allocation9 + $0x1e0] ss:$20 sps:$4 sm:$0xff]  }
  0xe9   : > { %988 = vmatpush2.bf16.msra.mxu0 %v3319_v52  ;;  %1029 = vmatpush2.bf16.msra.mxu1 %v3320_v53  ;;  %v3400_v52 = vld [vmem:[#allocation9 + $0xa8] ss:$20 sps:$4 sm:$0xff]  }
  0xea   : > { %989 = vmatprep.subr.bf16.mxu0 %v3321_v54  ;;  %1030 = vmatprep.subr.bf16.mxu1 %v3323_v55  ;;  %v3405_v53 = vld [vmem:[#allocation9 + $0x1bc] ss:$20 sps:$4 sm:$0xff]   ;;  %v3408_v54 = vld [vmem:[#allocation9 + $0x84] ss:$20 sps:$4 sm:$0xff]  }
  0xeb   : > { %v3403_v55 = vld [vmem:[#allocation9 + $0x1b8] ss:$20 sps:$4 sm:$0xff]  }
  0xed   : > { %990 = vmatpush2.bf16.msra.mxu0 %v3325_v56  ;;  %1031 = vmatpush2.bf16.msra.mxu1 %v3326_v57  ;;  %v3406_v56 = vld [vmem:[#allocation9 + $0x80] ss:$20 sps:$4 sm:$0xff]  }
  0xee   : > { %991 = vmatprep.subr.bf16.mxu0 %v3327_v58  ;;  %1032 = vmatprep.subr.bf16.mxu1 %v3329_v59  ;;  %v3411_v57 = vld [vmem:[#allocation9 + $0x194] ss:$20 sps:$4 sm:$0xff]   ;;  %v3414_v58 = vld [vmem:[#allocation9 + $0x5c] ss:$20 sps:$4 sm:$0xff]  }
  0xef   : > { %v3409_v59 = vld [vmem:[#allocation9 + $0x190] ss:$20 sps:$4 sm:$0xff]  }
  0xf1   : > { %992 = vmatpush2.bf16.msra.mxu0 %v3331_v60  ;;  %1033 = vmatpush2.bf16.msra.mxu1 %v3332_v61  ;;  %v3412_v60 = vld [vmem:[#allocation9 + $0x58] ss:$20 sps:$4 sm:$0xff]  }
  0xf2   : > { %993 = vmatprep.subr.bf16.mxu0 %v3333_v62  ;;  %1034 = vmatprep.subr.bf16.mxu1 %v3335_v63  ;;  %v3417_v61 = vld [vmem:[#allocation9 + $0x16c] ss:$20 sps:$4 sm:$0xff]   ;;  %v3420_v62 = vld [vmem:[#allocation9 + $0x34] ss:$20 sps:$4 sm:$0xff]  }
  0xf3   : > { %v3415_v63 = vld [vmem:[#allocation9 + $0x168] ss:$20 sps:$4 sm:$0xff]  }
  0xf5   : > { %994 = vmatpush2.bf16.msra.mxu0 %v3337_v0  ;;  %1035 = vmatpush2.bf16.msra.mxu1 %v3338_v1  ;;  %v3418_v0 = vld [vmem:[#allocation9 + $0x30] ss:$20 sps:$4 sm:$0xff]  }
  0xf6   : > { %2991 = vmatprep.subr.bf16.mxu0 %v3339_v3  ;;  %1597 = vmatprep.subr.bf16.mxu1 %v3342_v4  ;;  %v3423_v1 = vld [vmem:[#allocation9 + $0x144] ss:$20 sps:$4 sm:$0xff]   ;;  %v3421_v3 = vld [vmem:[#allocation9 + $0x140] ss:$20 sps:$4 sm:$0xff]   ;;  %v3424_v4 = vld [vmem:[#allocation9 + $0x8] ss:$20 sps:$4 sm:$0xff]  }
  0xf8   : > { %996 = vmatmul.mubr.bf16.vlgmr.msra.gmra.mxu0 %v4278_v5  ;;  %1037 = vmatmul.mubr.bf16.vlgmr.msra.gmra.mxu1 %v4278_v5 }
  0xf9   : > { %2992 = vmatpush3.bf16.msra.mxu0 %v3343_v7  ;;  %1598 = vmatpush1.bf16.msra.mxu1 %v3340_v6  ;;  %v3429_v6 = vld [vmem:[#allocation9 + $0x264] ss:$20 sps:$4 sm:$0xff]   ;;  %v3430_v7 = vld [vmem:[#allocation9 + $0x268] ss:$20 sps:$4 sm:$0xff]  }
  0xfa   : > { %2993 = vmatprep.subr.bf16.mxu0 %v3344_v8  ;;  %1599 = vmatprep.subr.bf16.mxu1 %v3347_v9  ;;  %v3427_v8 = vld [vmem:[#allocation9 + $0x260] ss:$20 sps:$4 sm:$0xff]   ;;  %v3431_v9 = vld [vmem:[#allocation9 + $0x128] ss:$20 sps:$4 sm:$0xff]  }
  0xfb   : > { %1077 = vmatprep.mubr.bf16.mxu0 %v4272_v48  ;;  %1629 = vmatprep.mubr.bf16.mxu1 %v4272_v48 }
  0xfd   : > { %2994 = vmatpush3.bf16.msra.mxu0 %v3348_v11  ;;  %1600 = vmatpush1.bf16.msra.mxu1 %v3345_v10  ;;  %v3434_v10 = vld [vmem:[#allocation9 + $0x23c] ss:$20 sps:$4 sm:$0xff]   ;;  %v3435_v11 = vld [vmem:[#allocation9 + $0x240] ss:$20 sps:$4 sm:$0xff]  }
  0xfe   : > { %2995 = vmatprep.subr.bf16.mxu0 %v3349_v12  ;;  %1601 = vmatprep.subr.bf16.mxu1 %v3352_v13  ;;  %v3432_v12 = vld [vmem:[#allocation9 + $0x238] ss:$20 sps:$4 sm:$0xff]   ;;  %v3436_v13 = vld [vmem:[#allocation9 + $0x100] ss:$20 sps:$4 sm:$0xff]  }
 0x101   : > { %2996 = vmatpush3.bf16.msra.mxu0 %v3353_v15  ;;  %1602 = vmatpush1.bf16.msra.mxu1 %v3350_v14  ;;  %v3439_v14 = vld [vmem:[#allocation9 + $0x214] ss:$20 sps:$4 sm:$0xff]   ;;  %v3440_v15 = vld [vmem:[#allocation9 + $0x218] ss:$20 sps:$4 sm:$0xff]  }
 0x102   : > { %2997 = vmatprep.subr.bf16.mxu0 %v3354_v16  ;;  %1603 = vmatprep.subr.bf16.mxu1 %v3357_v17  ;;  %v3437_v16 = vld [vmem:[#allocation9 + $0x210] ss:$20 sps:$4 sm:$0xff]   ;;  %v3441_v17 = vld [vmem:[#allocation9 + $0xd8] ss:$20 sps:$4 sm:$0xff]  }
 0x105   : > { %2998 = vmatpush3.bf16.msra.mxu0 %v3358_v19  ;;  %1604 = vmatpush1.bf16.msra.mxu1 %v3355_v18  ;;  %v3444_v18 = vld [vmem:[#allocation9 + $0x1ec] ss:$20 sps:$4 sm:$0xff]   ;;  %v3445_v19 = vld [vmem:[#allocation9 + $0x1f0] ss:$20 sps:$4 sm:$0xff]  }
 0x106   : > { %2999 = vmatprep.subr.bf16.mxu0 %v3359_v20  ;;  %1605 = vmatprep.subr.bf16.mxu1 %v3362_v21  ;;  %v3442_v20 = vld [vmem:[#allocation9 + $0x1e8] ss:$20 sps:$4 sm:$0xff]   ;;  %v3446_v21 = vld [vmem:[#allocation9 + $0xb0] ss:$20 sps:$4 sm:$0xff]  }
 0x109   : > { %3000 = vmatpush3.bf16.msra.mxu0 %v3363_v23  ;;  %1606 = vmatpush1.bf16.msra.mxu1 %v3360_v22  ;;  %v3449_v22 = vld [vmem:[#allocation9 + $0x1c4] ss:$20 sps:$4 sm:$0xff]   ;;  %v3450_v23 = vld [vmem:[#allocation9 + $0x1c8] ss:$20 sps:$4 sm:$0xff]  }
 0x10a   : > { %3001 = vmatprep.subr.bf16.mxu0 %v3364_v24  ;;  %1607 = vmatprep.subr.bf16.mxu1 %v3367_v25  ;;  %v3447_v24 = vld [vmem:[#allocation9 + $0x1c0] ss:$20 sps:$4 sm:$0xff]   ;;  %v3451_v25 = vld [vmem:[#allocation9 + $0x88] ss:$20 sps:$4 sm:$0xff]  }
 0x10d   : > { %3002 = vmatpush3.bf16.msra.mxu0 %v3368_v27  ;;  %1608 = vmatpush1.bf16.msra.mxu1 %v3365_v26  ;;  %v3454_v26 = vld [vmem:[#allocation9 + $0x19c] ss:$20 sps:$4 sm:$0xff]   ;;  %v3455_v27 = vld [vmem:[#allocation9 + $0x1a0] ss:$20 sps:$4 sm:$0xff]  }
 0x10e   : > { %3003 = vmatprep.subr.bf16.mxu0 %v3369_v28  ;;  %1609 = vmatprep.subr.bf16.mxu1 %v3372_v29  ;;  %v3456_v28 = vld [vmem:[#allocation9 + $0x60] ss:$20 sps:$4 sm:$0xff]  }
 0x10f   : > { %v3459_v29 = vld [vmem:[#allocation9 + $0x174] ss:$20 sps:$4 sm:$0xff]  }
 0x111   : > { %3004 = vmatpush3.bf16.msra.mxu0 %v3373_v31  ;;  %1610 = vmatpush1.bf16.msra.mxu1 %v3370_v30  ;;  %v3460_v30 = vld [vmem:[#allocation9 + $0x178] ss:$20 sps:$4 sm:$0xff]   ;;  %v3457_v31 = vld [vmem:[#allocation9 + $0x170] ss:$20 sps:$4 sm:$0xff]  }
 0x112   : > { %3005 = vmatprep.subr.bf16.mxu0 %v3374_v32  ;;  %1611 = vmatprep.subr.bf16.mxu1 %v3377_v33  ;;  %v3461_v32 = vld [vmem:[#allocation9 + $0x38] ss:$20 sps:$4 sm:$0xff]  }
 0x113   : > { %v3464_v33 = vld [vmem:[#allocation9 + $0x14c] ss:$20 sps:$4 sm:$0xff]  }
 0x115   : > { %3006 = vmatpush3.bf16.msra.mxu0 %v3378_v35  ;;  %1612 = vmatpush1.bf16.msra.mxu1 %v3375_v34  ;;  %v3465_v34 = vld [vmem:[#allocation9 + $0x150] ss:$20 sps:$4 sm:$0xff]   ;;  %v3462_v35 = vld [vmem:[#allocation9 + $0x148] ss:$20 sps:$4 sm:$0xff]  }
 0x116   : > { %1613 = vmatprep.subr.bf16.mxu1 %v3381_v36  ;;  %1638 = vmatprep.subr.bf16.mxu0 %v3384_v37  ;;  %v3466_v36 = vld [vmem:[#allocation9 + $0x10] ss:$20 sps:$4 sm:$0xff]   ;;  %v3469_v37 = vld [vmem:[#allocation11 + $0x74] ss:$8 sps:$4 sm:$0xff]  }
 0x118   : > { %1078 = vmatmul.mubr.bf16.vlgmr.msra.gmra.mxu0 %v4278_v5 }
 0x119   : > { %1614 = vmatpush2.bf16.msra.mxu1 %v3379_v38  ;;  %1639 = vmatpush1.bf16.msra.mxu0 %v3382_v39  ;;  %v3467_v38 = vld [vmem:[#allocation11 + $0x70] ss:$8 sps:$4 sm:$0xff]   ;;  %v3472_v39 = vld [vmem:[#allocation11 + $0x64] ss:$8 sps:$4 sm:$0xff]  }
 0x11a   : > { %1615 = vmatprep.subr.bf16.mxu1 %v3387_v40  ;;  %1640 = vmatprep.subr.bf16.mxu0 %v3390_v41  ;;  %v3470_v40 = vld [vmem:[#allocation11 + $0x60] ss:$8 sps:$4 sm:$0xff]   ;;  %v3475_v41 = vld [vmem:[#allocation11 + $0x54] ss:$8 sps:$4 sm:$0xff]  }
 0x11b   : > { %1670 = vmatprep.mubr.bf16.mxu0 %v4272_v48 }
 0x11d   : > { %1616 = vmatpush2.bf16.msra.mxu1 %v3385_v42  ;;  %1641 = vmatpush1.bf16.msra.mxu0 %v3388_v43  ;;  %v3473_v42 = vld [vmem:[#allocation11 + $0x50] ss:$8 sps:$4 sm:$0xff]   ;;  %v3478_v43 = vld [vmem:[#allocation11 + $0x44] ss:$8 sps:$4 sm:$0xff]  }
 0x11e   : > { %1617 = vmatprep.subr.bf16.mxu1 %v3393_v44  ;;  %1642 = vmatprep.subr.bf16.mxu0 %v3396_v45  ;;  %v3496_v44 = vld [vmem:[#allocation11 + $0x174] ss:$8 sps:$4 sm:$0xff]   ;;  %v3494_v45 = vld [vmem:[#allocation11 + $0x170] ss:$8 sps:$4 sm:$0xff]  }
 0x121   : > { %1618 = vmatpush2.bf16.msra.mxu1 %v3391_v46  ;;  %1643 = vmatpush1.bf16.msra.mxu0 %v3394_v47  ;;  %v3476_v46 = vld [vmem:[#allocation11 + $0x40] ss:$8 sps:$4 sm:$0xff]   ;;  %v3481_v47 = vld [vmem:[#allocation11 + $0x34] ss:$8 sps:$4 sm:$0xff]  }
 0x122   : > { %1619 = vmatprep.subr.bf16.mxu1 %v3399_v49  ;;  %1644 = vmatprep.subr.bf16.mxu0 %v3402_v50  ;;  %v3502_v49 = vld [vmem:[#allocation11 + $0x164] ss:$8 sps:$4 sm:$0xff]   ;;  %v3500_v50 = vld [vmem:[#allocation11 + $0x160] ss:$8 sps:$4 sm:$0xff]  }
 0x125   : > { %1620 = vmatpush2.bf16.msra.mxu1 %v3397_v51  ;;  %1645 = vmatpush1.bf16.msra.mxu0 %v3400_v52  ;;  %v3484_v51 = vld [vmem:[#allocation11 + $0x24] ss:$8 sps:$4 sm:$0xff]   ;;  %v3508_v52 = vld [vmem:[#allocation11 + $0x154] ss:$8 sps:$4 sm:$0xff]  }
 0x126   : > { %1621 = vmatprep.subr.bf16.mxu1 %v3405_v53  ;;  %1646 = vmatprep.subr.bf16.mxu0 %v3408_v54  ;;  %v3506_v53 = vld [vmem:[#allocation11 + $0x150] ss:$8 sps:$4 sm:$0xff]   ;;  %v3482_v54 = vld [vmem:[#allocation11 + $0x20] ss:$8 sps:$4 sm:$0xff]  }
 0x129   : > { %1622 = vmatpush2.bf16.msra.mxu1 %v3403_v55  ;;  %1647 = vmatpush1.bf16.msra.mxu0 %v3406_v56  ;;  %v3487_v55 = vld [vmem:[#allocation11 + $0x14] ss:$8 sps:$4 sm:$0xff]   ;;  %v3514_v56 = vld [vmem:[#allocation11 + $0x144] ss:$8 sps:$4 sm:$0xff]  }
 0x12a   : > { %1623 = vmatprep.subr.bf16.mxu1 %v3411_v57  ;;  %1648 = vmatprep.subr.bf16.mxu0 %v3414_v58  ;;  %v3512_v57 = vld [vmem:[#allocation11 + $0x140] ss:$8 sps:$4 sm:$0xff]   ;;  %v3485_v58 = vld [vmem:[#allocation11 + $0x10] ss:$8 sps:$4 sm:$0xff]  }
 0x12d   : > { %1624 = vmatpush2.bf16.msra.mxu1 %v3409_v59  ;;  %1649 = vmatpush1.bf16.msra.mxu0 %v3412_v60  ;;  %v3490_v59 = vld [vmem:[#allocation11 + $0x4] ss:$8 sps:$4 sm:$0xff]   ;;  %v3520_v60 = vld [vmem:[#allocation11 + $0x134] ss:$8 sps:$4 sm:$0xff]  }
 0x12e   : > { %1625 = vmatprep.subr.bf16.mxu1 %v3417_v61  ;;  %1650 = vmatprep.subr.bf16.mxu0 %v3420_v62  ;;  %v3518_v61 = vld [vmem:[#allocation11 + $0x130] ss:$8 sps:$4 sm:$0xff]   ;;  %v3488_v62 = vld [vmem:[#allocation11] ss:$8 sps:$4 sm:$0xff]  }
 0x131   : > { %1626 = vmatpush2.bf16.msra.mxu1 %v3415_v63  ;;  %1651 = vmatpush1.bf16.msra.mxu0 %v3418_v0  ;;  %v3493_v63 = vld [vmem:[#allocation11 + $0xf4] ss:$8 sps:$4 sm:$0xff]   ;;  %v3526_v0 = vld [vmem:[#allocation11 + $0x124] ss:$8 sps:$4 sm:$0xff]  }
 0x132   : > { %1627 = vmatprep.subr.bf16.mxu1 %v3423_v1  ;;  %1652 = vmatprep.subr.bf16.mxu0 %v3426_v2  ;;  %v3524_v1 = vld [vmem:[#allocation11 + $0x120] ss:$8 sps:$4 sm:$0xff]   ;;  %v3491_v2 = vld [vmem:[#allocation11 + $0xf0] ss:$8 sps:$4 sm:$0xff]  }
 0x135   : > { %1628 = vmatpush2.bf16.msra.mxu1 %v3421_v3  ;;  %1653 = vmatpush1.bf16.msra.mxu0 %v3424_v4  ;;  %v3499_v3 = vld [vmem:[#allocation11 + $0xe4] ss:$8 sps:$4 sm:$0xff]   ;;  %v3532_v4 = vld [vmem:[#allocation11 + $0x114] ss:$8 sps:$4 sm:$0xff]  }
 0x136   : > { %1654 = vmatprep.subr.bf16.mxu0 %v3429_v6  ;;  %3013 = vmatprep.subr.bf16.mxu1 %v3430_v7  ;;  %v3530_v6 = vld [vmem:[#allocation11 + $0x110] ss:$8 sps:$4 sm:$0xff]   ;;  %v3497_v7 = vld [vmem:[#allocation11 + $0xe0] ss:$8 sps:$4 sm:$0xff]  }
 0x138   : > { %1630 = vmatmul.mubr.bf16.vlgmr.msra.gmra.mxu1 %v4278_v5 }
 0x139   : > { %1655 = vmatpush2.bf16.msra.mxu0 %v3427_v8  ;;  %3014 = vmatpush3.bf16.msra.mxu1 %v3431_v9  ;;  %v3505_v8 = vld [vmem:[#allocation11 + $0xd4] ss:$8 sps:$4 sm:$0xff]   ;;  %v3538_v9 = vld [vmem:[#allocation11 + $0x104] ss:$8 sps:$4 sm:$0xff]  }
 0x13a   : > { %1656 = vmatprep.subr.bf16.mxu0 %v3434_v10  ;;  %3015 = vmatprep.subr.bf16.mxu1 %v3435_v11  ;;  %v3536_v10 = vld [vmem:[#allocation11 + $0x100] ss:$8 sps:$4 sm:$0xff]   ;;  %v3503_v11 = vld [vmem:[#allocation11 + $0xd0] ss:$8 sps:$4 sm:$0xff]  }
 0x13b   : > { %1711 = vmatprep.mubr.bf16.mxu1 %v4272_v48  ;;  %v3452_v48 = vld [vmem:[#allocation9 + $0x198] ss:$20 sps:$4 sm:$0xff]  }
 0x13d   : > { %1657 = vmatpush2.bf16.msra.mxu0 %v3432_v12  ;;  %3016 = vmatpush3.bf16.msra.mxu1 %v3436_v13  ;;  %v3511_v12 = vld [vmem:[#allocation11 + $0xc4] ss:$8 sps:$4 sm:$0xff]   ;;  %v3541_v13 = vld [vmem:[#allocation11 + $0x1f4] ss:$8 sps:$4 sm:$0xff]  }
 0x13e   : > { %1658 = vmatprep.subr.bf16.mxu0 %v3439_v14  ;;  %3017 = vmatprep.subr.bf16.mxu1 %v3440_v15  ;;  %v3539_v14 = vld [vmem:[#allocation11 + $0x1f0] ss:$8 sps:$4 sm:$0xff]   ;;  %v3509_v15 = vld [vmem:[#allocation11 + $0xc0] ss:$8 sps:$4 sm:$0xff]  }
 0x141   : > { %1659 = vmatpush2.bf16.msra.mxu0 %v3437_v16  ;;  %3018 = vmatpush3.bf16.msra.mxu1 %v3441_v17  ;;  %v3547_v16 = vld [vmem:[#allocation11 + $0x1e4] ss:$8 sps:$4 sm:$0xff]   ;;  %v3517_v17 = vld [vmem:[#allocation11 + $0xb4] ss:$8 sps:$4 sm:$0xff]  }
 0x142   : > { %1660 = vmatprep.subr.bf16.mxu0 %v3444_v18  ;;  %3019 = vmatprep.subr.bf16.mxu1 %v3445_v19  ;;  %v3545_v18 = vld [vmem:[#allocation11 + $0x1e0] ss:$8 sps:$4 sm:$0xff]   ;;  %v3515_v19 = vld [vmem:[#allocation11 + $0xb0] ss:$8 sps:$4 sm:$0xff]  }
 0x145   : > { %1661 = vmatpush2.bf16.msra.mxu0 %v3442_v20  ;;  %3020 = vmatpush3.bf16.msra.mxu1 %v3446_v21  ;;  %v3553_v20 = vld [vmem:[#allocation11 + $0x1d4] ss:$8 sps:$4 sm:$0xff]   ;;  %v3523_v21 = vld [vmem:[#allocation11 + $0xa4] ss:$8 sps:$4 sm:$0xff]  }
 0x146   : > { %1662 = vmatprep.subr.bf16.mxu0 %v3449_v22  ;;  %3021 = vmatprep.subr.bf16.mxu1 %v3450_v23  ;;  %v3551_v22 = vld [vmem:[#allocation11 + $0x1d0] ss:$8 sps:$4 sm:$0xff]   ;;  %v3521_v23 = vld [vmem:[#allocation11 + $0xa0] ss:$8 sps:$4 sm:$0xff]  }
 0x149   : > { %1663 = vmatpush2.bf16.msra.mxu0 %v3447_v24  ;;  %3022 = vmatpush3.bf16.msra.mxu1 %v3451_v25  ;;  %v3559_v24 = vld [vmem:[#allocation11 + $0x1c4] ss:$8 sps:$4 sm:$0xff]   ;;  %v3529_v25 = vld [vmem:[#allocation11 + $0x94] ss:$8 sps:$4 sm:$0xff]  }
 0x14a   : > { %1664 = vmatprep.subr.bf16.mxu0 %v3454_v26  ;;  %3023 = vmatprep.subr.bf16.mxu1 %v3455_v27  ;;  %v3557_v26 = vld [vmem:[#allocation11 + $0x1c0] ss:$8 sps:$4 sm:$0xff]   ;;  %v3527_v27 = vld [vmem:[#allocation11 + $0x90] ss:$8 sps:$4 sm:$0xff]  }
 0x14d   : > { %1665 = vmatpush2.bf16.msra.mxu0 %v3452_v48  ;;  %3024 = vmatpush3.bf16.msra.mxu1 %v3456_v28  ;;  %v3565_v48 = vld [vmem:[#allocation11 + $0x1b4] ss:$8 sps:$4 sm:$0xff]   ;;  %v3535_v28 = vld [vmem:[#allocation11 + $0x84] ss:$8 sps:$4 sm:$0xff]  }
 0x14e   : > { %1666 = vmatprep.subr.bf16.mxu0 %v3459_v29  ;;  %3025 = vmatprep.subr.bf16.mxu1 %v3460_v30  ;;  %v3563_v29 = vld [vmem:[#allocation11 + $0x1b0] ss:$8 sps:$4 sm:$0xff]   ;;  %v3533_v30 = vld [vmem:[#allocation11 + $0x80] ss:$8 sps:$4 sm:$0xff]  }
 0x151   : > { %1667 = vmatpush2.bf16.msra.mxu0 %v3457_v31  ;;  %3026 = vmatpush3.bf16.msra.mxu1 %v3461_v32  ;;  %v3571_v31 = vld [vmem:[#allocation11 + $0x1a4] ss:$8 sps:$4 sm:$0xff]   ;;  %v3544_v32 = vld [vmem:[#allocation11 + $0x274] ss:$8 sps:$4 sm:$0xff]  }
 0x152   : > { %1668 = vmatprep.subr.bf16.mxu0 %v3464_v33  ;;  %3027 = vmatprep.subr.bf16.mxu1 %v3465_v34  ;;  %v3569_v33 = vld [vmem:[#allocation11 + $0x1a0] ss:$8 sps:$4 sm:$0xff]   ;;  %v3577_v34 = vld [vmem:[#allocation11 + $0x194] ss:$8 sps:$4 sm:$0xff]  }
 0x155   : > { %1669 = vmatpush2.bf16.msra.mxu0 %v3462_v35  ;;  %3028 = vmatpush3.bf16.msra.mxu1 %v3466_v36  ;;  %v3575_v35 = vld [vmem:[#allocation11 + $0x190] ss:$8 sps:$4 sm:$0xff]   ;;  %v3583_v36 = vld [vmem:[#allocation11 + $0x184] ss:$8 sps:$4 sm:$0xff]  }
 0x156   : > { %2244 = vmatprep.subr.bf16.mxu0 %v3469_v37  ;;  %2285 = vmatprep.subr.bf16.mxu1 %v3496_v44  ;;  %v3581_v37 = vld [vmem:[#allocation11 + $0x180] ss:$8 sps:$4 sm:$0xff]  }
 0x158   : > { %1671 = vmatmul.mubr.bf16.vlgmr.msra.gmra.mxu0 %v4278_v5  ;;  %1712 = vmatmul.mubr.bf16.vlgmr.msra.gmra.mxu1 %v4278_v5  ;;  %v3479_v5 = vld [vmem:[#allocation11 + $0x30] ss:$8 sps:$4 sm:$0xff]  }
 0x159   : > { %2245 = vmatpush1.bf16.msra.mxu0 %v3467_v38  ;;  %2286 = vmatpush1.bf16.msra.mxu1 %v3494_v45 }
 0x15a   : > { %2246 = vmatprep.subr.bf16.mxu0 %v3472_v39  ;;  %2287 = vmatprep.subr.bf16.mxu1 %v3502_v49 }
 0x15d   : > { %2247 = vmatpush1.bf16.msra.mxu0 %v3470_v40  ;;  %2288 = vmatpush1.bf16.msra.mxu1 %v3500_v50 }
 0x15e   : > { %2248 = vmatprep.subr.bf16.mxu0 %v3475_v41  ;;  %2289 = vmatprep.subr.bf16.mxu1 %v3508_v52 }
 0x161   : > { %2249 = vmatpush1.bf16.msra.mxu0 %v3473_v42  ;;  %2290 = vmatpush1.bf16.msra.mxu1 %v3506_v53 }
 0x162   : > { %2250 = vmatprep.subr.bf16.mxu0 %v3478_v43  ;;  %2291 = vmatprep.subr.bf16.mxu1 %v3514_v56 }
 0x165   : > { %2251 = vmatpush1.bf16.msra.mxu0 %v3476_v46  ;;  %2292 = vmatpush1.bf16.msra.mxu1 %v3512_v57 }
 0x166   : > { %2252 = vmatprep.subr.bf16.mxu0 %v3481_v47  ;;  %2293 = vmatprep.subr.bf16.mxu1 %v3520_v60 }
 0x169   : > { %2253 = vmatpush1.bf16.msra.mxu0 %v3479_v5  ;;  %2294 = vmatpush1.bf16.msra.mxu1 %v3518_v61 }
 0x16a   : > { %2254 = vmatprep.subr.bf16.mxu0 %v3484_v51  ;;  %2295 = vmatprep.subr.bf16.mxu1 %v3526_v0 }
 0x16d   : > { %2255 = vmatpush1.bf16.msra.mxu0 %v3482_v54  ;;  %2296 = vmatpush1.bf16.msra.mxu1 %v3524_v1 }
 0x16e   : > { %2256 = vmatprep.subr.bf16.mxu0 %v3487_v55  ;;  %2297 = vmatprep.subr.bf16.mxu1 %v3532_v4 }
 0x171   : > { %2257 = vmatpush1.bf16.msra.mxu0 %v3485_v58  ;;  %2298 = vmatpush1.bf16.msra.mxu1 %v3530_v6 }
 0x172   : > { %2258 = vmatprep.subr.bf16.mxu0 %v3490_v59  ;;  %2299 = vmatprep.subr.bf16.mxu1 %v3538_v9 }
 0x175   : > { %2259 = vmatpush1.bf16.msra.mxu0 %v3488_v62  ;;  %2300 = vmatpush1.bf16.msra.mxu1 %v3536_v10  ;;  %v3550_v10 = vld [vmem:[#allocation11 + $0x264] ss:$8 sps:$4 sm:$0xff]  }
 0x176   : > { %2260 = vmatprep.subr.bf16.mxu0 %v3493_v63  ;;  %2301 = vmatprep.subr.bf16.mxu1 %v3541_v13  ;;  %v3956_v13 = vmov 0  }
 0x179   : > { %2261 = vmatpush2.bf16.msra.mxu0 %v3491_v2  ;;  %2302 = vmatpush2.bf16.msra.mxu1 %v3539_v14 }
 0x17a   : > { %2262 = vmatprep.subr.bf16.mxu0 %v3499_v3  ;;  %2303 = vmatprep.subr.bf16.mxu1 %v3547_v16 }
 0x17d   : > { %2263 = vmatpush2.bf16.msra.mxu0 %v3497_v7  ;;  %2304 = vmatpush2.bf16.msra.mxu1 %v3545_v18  ;;  %v3542_v7 = vld [vmem:[#allocation11 + $0x270] ss:$8 sps:$4 sm:$0xff]  }
 0x17e   : > { %2264 = vmatprep.subr.bf16.mxu0 %v3505_v8  ;;  %2305 = vmatprep.subr.bf16.mxu1 %v3553_v20  ;;  %v3562_v20 = vld [vmem:[#allocation11 + $0x244] ss:$8 sps:$4 sm:$0xff]  }
 0x181   : > { %2265 = vmatpush2.bf16.msra.mxu0 %v3503_v11  ;;  %2306 = vmatpush2.bf16.msra.mxu1 %v3551_v22  ;;  %v3560_v22 = vld [vmem:[#allocation11 + $0x240] ss:$8 sps:$4 sm:$0xff]  }
 0x182   : > { %2266 = vmatprep.subr.bf16.mxu0 %v3511_v12  ;;  %2307 = vmatprep.subr.bf16.mxu1 %v3559_v24  ;;  %v3548_v12 = vld [vmem:[#allocation11 + $0x260] ss:$8 sps:$4 sm:$0xff]   ;;  %v3566_v24 = vld [vmem:[#allocation11 + $0x230] ss:$8 sps:$4 sm:$0xff]  }
 0x185   : > { %2267 = vmatpush2.bf16.msra.mxu0 %v3509_v15  ;;  %2308 = vmatpush2.bf16.msra.mxu1 %v3557_v26  ;;  %v3556_v15 = vld [vmem:[#allocation11 + $0x254] ss:$8 sps:$4 sm:$0xff]   ;;  %v3572_v26 = vld [vmem:[#allocation11 + $0x220] ss:$8 sps:$4 sm:$0xff]  }
 0x186   : > { %2268 = vmatprep.subr.bf16.mxu0 %v3517_v17  ;;  %2309 = vmatprep.subr.bf16.mxu1 %v3565_v48 }
 0x189   : > { %2269 = vmatpush2.bf16.msra.mxu0 %v3515_v19  ;;  %2310 = vmatpush2.bf16.msra.mxu1 %v3563_v29  ;;  %v3554_v19 = vld [vmem:[#allocation11 + $0x250] ss:$8 sps:$4 sm:$0xff]  }
 0x18a   : > { %2270 = vmatprep.subr.bf16.mxu0 %v3523_v21  ;;  %2311 = vmatprep.subr.bf16.mxu1 %v3571_v31 }
 0x18d   : > { %2271 = vmatpush2.bf16.msra.mxu0 %v3521_v23  ;;  %2312 = vmatpush2.bf16.msra.mxu1 %v3569_v33  ;;  %v3568_v23 = vld [vmem:[#allocation11 + $0x234] ss:$8 sps:$4 sm:$0xff]  }
 0x18e   : > { %2272 = vmatprep.subr.bf16.mxu0 %v3529_v25  ;;  %2313 = vmatprep.subr.bf16.mxu1 %v3577_v34  ;;  %v3574_v25 = vld [vmem:[#allocation11 + $0x224] ss:$8 sps:$4 sm:$0xff]  }
 0x191   : > { %2273 = vmatpush2.bf16.msra.mxu0 %v3527_v27  ;;  %2314 = vmatpush2.bf16.msra.mxu1 %v3575_v35  ;;  %v3580_v27 = vld [vmem:[#allocation11 + $0x214] ss:$8 sps:$4 sm:$0xff]  }
 0x192   : > { %2274 = vmatprep.subr.bf16.mxu0 %v3535_v28  ;;  %2315 = vmatprep.subr.bf16.mxu1 %v3583_v36  ;;  %v3578_v28 = vld [vmem:[#allocation11 + $0x210] ss:$8 sps:$4 sm:$0xff]   ;;  %v3584_v36 = vld [vmem:[#allocation11 + $0x200] ss:$8 sps:$4 sm:$0xff]  }
 0x195   : > { %2275 = vmatpush2.bf16.msra.mxu0 %v3533_v30  ;;  %2316 = vmatpush2.bf16.msra.mxu1 %v3581_v37  ;;  %v3586_v30 = vld [vmem:[#allocation11 + $0x204] ss:$8 sps:$4 sm:$0xff]  }
 0x196   : > { %2326 = vmatprep.subr.bf16.mxu0 %v3544_v32 }
 0x1b8   : > { %v997_v38 = vpop.f32.mrf.mxu0  ;;  %v4290_v39 = vpop.f32.mrf.mxu1 }
 0x1b9   : > { %v2886_v46 = vmul.f32 -1.442695, %v997_v38  ;;  %v2888_v57 = vmul.f32 -1.442695, %v4290_v39 }
 0x1ba   : > { %v999_v40 = vpop.f32.mrf.mxu0  ;;  %v4292_v41 = vpop.f32.mrf.mxu1 }
 0x1bb   : > { %v2887_v47 = vmul.f32 -1.442695, %v999_v40  ;;  %3587 = vpow2.f32 %v2886_v46  ;;  %v2889_v58 = vmul.f32 -1.442695, %v4292_v41 }
 0x1bc   : > { %v1001_v42 = vpop.f32.mrf.mxu0  ;;  %v1042_v43 = vpop.f32.mrf.mxu1 }
 0x1bd   : > { %3589 = vpow2.f32 %v2887_v47 }
 0x1be   : > { %v1002_v44 = vpop.f32.mrf.mxu0  ;;  %v1043_v45 = vpop.f32.mrf.mxu1 }
 0x1c8   : > { %v3588_v52 = vpop.eup %3587 }
 0x1c9   : > { %v1734_v54 = vadd.f32 1.0, %v3588_v52 }
 0x1ca   : > { %v3590_v53 = vpop.eup %3589 }
 0x1cb   : > { %v1735_v55 = vadd.f32 1.0, %v3590_v53  ;;  %3591 = vrcp.f32 %v1734_v54 }
 0x1cd   : > { %3593 = vrcp.f32 %v1735_v55 }
 0x1ce   : > { %3595 = vpow2.f32 %v2888_v57 }
 0x1cf   : > { %3597 = vpow2.f32 %v2889_v58 }
 0x1d8   : > { %v3007_v49 = vpop.f32.mrf.mxu0  ;;  %v3592_v60 = vpop.eup %3591 }
 0x1d9   : > { %v1749_v62 = vmul.f32 %v3592_v60, %v997_v38 }
 0x1da   : > { %v3008_v50 = vpop.f32.mrf.mxu0  ;;  %v3594_v61 = vpop.eup %3593 }
 0x1db   : > { %v4294_v56 = vadd.f32 %v3008_v50, %v3007_v49  ;;  %v1750_v0 = vmul.f32 %v3594_v61, %v999_v40  ;;  %v3596_v11 = vpop.eup %3595 }
 0x1dc   : > { %v3010_v5 = vpop.f32.mrf.mxu0  ;;  %v3598_v14 = vpop.eup %3597  ;;  %v1736_v17 = vadd.f32 1.0, %v3596_v11 }
 0x1dd   : > { %v2890_v59 = vmul.f32 -1.442695, %v4294_v56  ;;  %v1737_v18 = vadd.f32 1.0, %v3598_v14 }
 0x1de   : > { %v3011_v51 = vpop.f32.mrf.mxu0 }
 0x1df   : > { %3599 = vpow2.f32 %v2890_v59 }
 0x1e0   : > { %3601 = vrcp.f32 %v1736_v17 }
 0x1e1   : > { %3603 = vrcp.f32 %v1737_v18 }
 0x1ec   : > { %v3600_v16 = vpop.eup %3599 }
 0x1ed   : > { %v1738_v21 = vadd.f32 1.0, %v3600_v16  ;;  %v3602_v48 = vpop.eup %3601 }
 0x1ee   : > { %v3604_v29 = vpop.eup %3603  ;;  %v1751_v32 = vmul.f32 %v3602_v48, %v4290_v39 }
 0x1ef   : > { %3605 = vrcp.f32 %v1738_v21  ;;  %v1752_v35 = vmul.f32 %v3604_v29, %v4292_v41 }
 0x1f8   : > { %v1631_v63 = vpop.f32.mrf.mxu1 }
 0x1f9   : > { %v1754_v1 = vmul.f32 %v1749_v62, %v1631_v63 }
 0x1fa   : > { %v1633_v2 = vpop.f32.mrf.mxu1 }
 0x1fb   : > { %v1755_v3 = vmul.f32 %v1750_v0, %v1633_v2  ;;  %v1759_v8 = vpack.c.bf16 %v1754_v1, %v1754_v1 }
 0x1fc   : > { %v1635_v4 = vpop.f32.mrf.mxu1  ;;  %v3606_v31 = vpop.eup %3605 }
 0x1fd   : > { %v1760_v6 = vpack.c.bf16 %v1755_v3, %v1755_v3  ;;  %v1753_v42 = vmul.f32 %v3606_v31, %v4294_v56  ;;  %v3609_v3 = vld [vmem:[%s371_s25] sm:$0xff]  ;;  %s4471_s25 = sld [smem:[#allocation35_spill]] }
 0x1fe   : > { %v1636_v9 = vpop.f32.mrf.mxu1 }
 0x1ff   : > { %2276 = vmatprep.mubr.bf16.mxu0 %v1760_v6  ;;  %v3610_v6 = vld [vmem:[%s380_s20] sm:$0xff] }
 0x200   : > { %2277 = vmatmul.mubr.bf16.vlgmr.msra.gmra.mxu0 %v1759_v8 }
 0x201   : > { %2327 = vmatpush1.bf16.msra.mxu0 %v3542_v7  ;;  %2358 = vmatprep.mubr.bf16.mxu0 %v3956_v13 }
 0x202   : > { %2328 = vmatprep.subr.bf16.mxu0 %v3550_v10 }
 0x205   : > { %2329 = vmatpush1.bf16.msra.mxu0 %v3548_v12 }
 0x206   : > { %2330 = vmatprep.subr.bf16.mxu0 %v3556_v15 }
 0x209   : > { %2331 = vmatpush1.bf16.msra.mxu0 %v3554_v19  ;;  %v2388_v19 = vlaneseq }
 0x20a   : > { %2332 = vmatprep.subr.bf16.mxu0 %v3562_v20 }
 0x20b   : > { %v2389_v20 = vshrl.u32 %v2388_v19, 7 }
 0x20d   : > { %2333 = vmatpush1.bf16.msra.mxu0 %v3560_v22  ;;  %v2390_v21 = vsub.s32 0, %v2389_v20  ;;  %v2394_v22 = vsub.s32 1, %v2389_v20 }
 0x20e   : > { %2334 = vmatprep.subr.bf16.mxu0 %v3568_v23  ;;  %v2386_v23 = vld [vmem:[%s4471_s25] sm:$0x3] }
 0x211   : > { %2335 = vmatpush1.bf16.msra.mxu0 %v3566_v24  ;;  %v2391_v24 = vrot.slane %v2386_v23, %v2390_v21 }
 0x212   : > { %2336 = vmatprep.subr.bf16.mxu0 %v3574_v25  ;;  %v2395_v25 = vrot.slane %v2386_v23, %v2394_v22 }
 0x215   : > { %2337 = vmatpush1.bf16.msra.mxu0 %v3572_v26 }
 0x216   : > { %2338 = vmatprep.subr.bf16.mxu0 %v3580_v27 }
 0x218   : > { %v1672_v33 = vpop.f32.mrf.mxu0  ;;  %v3029_v34 = vpop.f32.mrf.mxu1 }
 0x219   : > { %2339 = vmatpush1.bf16.msra.mxu0 %v3578_v28  ;;  %v1756_v37 = vmul.f32 %v1751_v32, %v1672_v33 }
 0x21a   : > { %v1674_v38 = vpop.f32.mrf.mxu0  ;;  %v3030_v40 = vpop.f32.mrf.mxu1  ;;  %2340 = vmatprep.subr.bf16.mxu0 %v3586_v30 }
 0x21b   : > { %v1757_v43 = vmul.f32 %v1752_v35, %v1674_v38  ;;  %v3031_v44 = vadd.f32 %v3030_v40, %v3029_v34  ;;  %v1761_v39 = vpack.c.bf16 %v1756_v37, %v1756_v37 }
 0x21c   : > { %v1676_v45 = vpop.f32.mrf.mxu0  ;;  %v3032_v46 = vpop.f32.mrf.mxu1 }
 0x21d   : > { %v1762_v47 = vpack.c.bf16 %v1757_v43, %v1757_v43  ;;  %v1758_v49 = vmul.f32 %v3031_v44, %v1753_v42  ;;  %2341 = vmatpush1.bf16.msra.mxu0 %v3584_v36 }
 0x21e   : > { %v1677_v50 = vpop.f32.mrf.mxu0  ;;  %v3033_v5 = vpop.f32.mrf.mxu1 }
 0x21f   : > { %v1763_v51 = vpack.c.bf16 %v1758_v49, %v1758_v49  ;;  %2317 = vmatprep.mubr.bf16.mxu1 %v1762_v47 }
 0x220   : > { %2318 = vmatmul.mubr.bf16.vlgmr.msra.gmra.mxu1 %v1761_v39 }
 0x221   : > { %2359 = vmatmul.mubr.bf16.vlgmr.msra.gmra.mxu0 %v1763_v51 }
 0x2c0   : > { %v2278_v41 = vpop.f32.mrf.mxu0 }
 0x2c2   : > { %v2280_v52 = vpop.f32.mrf.mxu0 }
 0x2c4   : > { %v2282_v53 = vpop.f32.mrf.mxu0 }
 0x2c6   : > { %v2283_v54 = vpop.f32.mrf.mxu0 }
 0x2e0   : > { %v2319_v55 = vpop.f32.mrf.mxu1 }
 0x2e1   : > { %v2320_v56 = vadd.f32 %v2319_v55, %v2278_v41  ;;  %v2360_v57 = vpop.f32.mrf.mxu0 }
 0x2e2   : > { %v2321_v58 = vpop.f32.mrf.mxu1 }
 0x2e3   : > { %v2361_v59 = vadd.f32 %v2360_v57, %v2320_v56  ;;  %v2322_v60 = vadd.f32 %v2321_v58, %v2280_v52  ;;  %v2362_v61 = vpop.f32.mrf.mxu0 }
 0x2e4   : > { %v2323_v62 = vpop.f32.mrf.mxu1 }
 0x2e5   : > { %v2363_v63 = vadd.f32 %v2362_v61, %v2322_v60  ;;  %v2364_v0 = vpop.f32.mrf.mxu0  ;;  %v2367_v4 = vadd.f32 %v3609_v3, %v2361_v59 }
 0x2e6   : > { %v2324_v1 = vpop.f32.mrf.mxu1 }
 0x2e7   : > { %v2365_v2 = vpop.f32.mrf.mxu0  ;;  %v2368_v7 = vadd.f32 %v3610_v6, %v2363_v63 }
 0x2e9   : > { %v2369_v8 = vadd.f32 %v2368_v7, %v2367_v4 }
 0x2eb   : > { %2370 = vadd.xlane.f32.xlu0 %v2369_v8 }
 0x374   : > { %v2371_v9 = vpop.xlane.xlu0 %2370 }
 0x375   : > { %v2373_v10 = vmul.f32 0.00390625, %v2371_v9 }
 0x377   : > { %v2374_v11 = vsub.f32 %v2367_v4, %v2373_v10  ;;  %v2375_v12 = vsub.f32 %v2368_v7, %v2373_v10 }
 0x379   : > { %v2376_v13 = vmul.f32 %v2374_v11, %v2374_v11  ;;  %v2377_v14 = vmul.f32 %v2375_v12, %v2375_v12 }
 0x37b   : > { %v2378_v15 = vadd.f32 %v2377_v14, %v2376_v13 }
 0x37d   : > { %2379 = vadd.xlane.f32.xlu0 %v2378_v15 }
 0x406   : > { %v2380_v16 = vpop.xlane.xlu0 %2379 }
 0x407   : > { %v2381_v17 = vmul.f32 0.00390625, %v2380_v16 }
 0x409   : > { %v2382_v18 = vadd.f32 1e-05, %v2381_v17 }
 0x40b   : > { %3607 = vrsqrt.f32 %v2382_v18 }
 0x418   : > { %v3608_v26 = vpop.eup %3607 }
 0x419   : > { %v2384_v27 = vmul.f32 %v3608_v26, %v2374_v11  ;;  %v2385_v48 = vmul.f32 %v3608_v26, %v2375_v12 }
 0x41b   : > { %v2398_v28 = vmul.f32 %v2391_v24, %v2384_v27  ;;  %v2399_v29 = vmul.f32 %v2395_v25, %v2385_v48 }
 0x41d   : > { %v2989_v30 = vpack.c.bf16 %v2399_v29, %v2398_v28 }
 0x41f   : > { %2990 = vst [vmem:[#allocation2] sm:$0xff] %v2989_v30  }
 0x420 PF: > { %v3611_v31 = vld [vmem:[%s4258_s3 + $0x38] sm:$0xff]   ;;  %v3957_v32 = vmov 0.0   ;;  %v3612_v33 = vld [vmem:[%s4258_s3 + $0x30] sm:$0xff]   ;;  %vm3958_vm0 = vmmov 0   ;;  %v3613_v34 = vld [vmem:[%s4258_s3 + $0x28] sm:$0xff]   ;;  %s4472_s19 = sld [smem:[#allocation25_spill]] }
 0x421   : > { %3044 = vmatprep.subr.bf16.mxu0 %v3957_v32  ;;  %3060 = vmatprep.mubr.msk.bf16.mxu0 %vm3958_vm0, %v3957_v32  ;;  %v3614_v35 = vld [vmem:[%s4258_s3 + $0x20] sm:$0xff]   ;;  %s4473_s11 = sld [smem:[#allocation24_spill]]  ;;  %v3615_v36 = vld [vmem:[%s4258_s3 + $0x18] sm:$0xff]   ;;  %v3616_v37 = vld [vmem:[%s4258_s3 + $0x10] sm:$0xff]   ;;  %s2537_s24 = sshll.u32 %s4267_s7, 4  ;;  %s4326_s24 = int_to_ptr.vmem [resolvable:$true] %s2537_s24 }
 0x422   : > { %3045 = vmatpush3.bf16.msra.mxu0 %v3611_v31  ;;  %v3617_v38 = vld [vmem:[%s4258_s3 + $0x8] sm:$0xff]   ;;  %v3618_v40 = vld [vmem:[%s4258_s3] sm:$0xff]   ;;  %s4475_s20 = sld [smem:[#allocation28_spill]]  ;;  %s4331_s3 = scalar_lea.sflag [#allocation5], %s439_s30 }
 0x423   : > { %3046 = vmatprep.subr.bf16.mxu0 %v3957_v32  ;;  %s4476_s22 = sld [smem:[#allocation36_spill]]  ;;  %s3782_s17 = scalar_lea.vmem %s4326_s24, 256 }
 0x424   : > { %p3783_p4 = scmp.ne.s32.totalorder %s4326_s24, %s3782_s17  ;;  %s3959_s21 = smov [#allocation14]  }
 0x425   : > { %s3786_s25 = sshll.u32 %s3959_s21, 4  ;;  %s3787_s25 = int_to_ptr.vmem [resolvable:$false] %s3786_s25 }
 0x426   : > { %3047 = vmatpush3.bf16.msra.mxu0 %v3612_v33  ;;  %v3619_v42 = vld [vmem:[#allocation2] sm:$0xff]   ;;  %s2982_s28 = sshll.u32 %s4472_s19, 2  ;;  %s3788_s19 = scalar_lea.vmem %s3787_s25, 512 }
 0x427   : > { %3048 = vmatprep.subr.bf16.mxu0 %v3957_v32  ;;  %s2534_s23 = sadd.s32 %s4473_s11, %s2982_s28  ;;  %p3789_p13 = scmp.lt.s32.totalorder %s4326_s24, %s3787_s25 }
 0x428   : > { %s2983_s10 = sshll.u32 %s2534_s23, 7  ;;  %p4477_p8 = scmp.ne.s32.totalorder %s4475_s20, 0 }
 0x429   : > { %s4324_s15 = scalar_lea.hbm %s4476_s22, %s2983_s10  ;;  %p3790_p7 = scmp.lt.s32.totalorder %s3788_s19, %s3782_s17 }
 0x42a   : > { %3049 = vmatpush3.bf16.msra.mxu0 %v3613_v34  ;;  %p3784_p2 = pnand %p3783_p4, %p4477_p8 }
 0x42b   : > { %3050 = vmatprep.subr.bf16.mxu0 %v3957_v32  ;;  %p3791_p0 = por %p3790_p7, %p3789_p13 }
 0x42c   : > { %p3785_p1 = pneg %p3784_p2 }
 0x42e   : > { %3051 = vmatpush3.bf16.msra.mxu0 %v3614_v35  ;;  %p3792_p12 = pnand %p3791_p0, %p3785_p1 }
 0x42f   : > { %3052 = vmatprep.subr.bf16.mxu0 %v3957_v32 }
 0x432   : > { %3053 = vmatpush3.bf16.msra.mxu0 %v3615_v36 }
 0x433   : > { %3054 = vmatprep.subr.bf16.mxu0 %v3957_v32 }
 0x436   : > { %3055 = vmatpush3.bf16.msra.mxu0 %v3616_v37 }
 0x437   : > { %3056 = vmatprep.subr.bf16.mxu0 %v3957_v32 }
 0x43a   : > { %3057 = vmatpush3.bf16.msra.mxu0 %v3617_v38 }
 0x43b   : > { %3058 = vmatprep.subr.bf16.mxu0 %v3957_v32 }
 0x43e   : > { %3059 = vmatpush3.bf16.msra.mxu0 %v3618_v40 }
 0x441   : > { %3061 = vmatmul.mubr.bf16.vlgmr.msra.gmra.mxu0 %v3619_v42 }
 0x501   : > { %v2510_v43 = vpop.f32.mrf.mxu0 }
 0x502   : > { %2517 = vst [vmem:[%s4267_s7] sm:$0xff] %v2510_v43 }
 0x503   : > { %v3062_v44 = vpop.f32.mrf.mxu0 }
 0x505   : > { %v2513_v45 = vpop.f32.mrf.mxu0 }
 0x506   : > { %2980 = vst [vmem:[%s4267_s7 + $0x8] sm:$0xff] %v2513_v45 }
 0x507   : > { %v3063_v46 = vpop.f32.mrf.mxu0 }
 0x508   : > { %3795 = shalt.err (!%p3792_p12)
}
 0x509   : > { %s3796_s30 = scalar_lea.hbm %s4324_s15, 256  ;;  %s3800_s4 = scalar_lea.hbm %s4476_s22, 1024 }
 0x50a   : > { %p3797_p6 = scmp.ne.s32.totalorder %s4324_s15, %s3796_s30  ;;  %p3801_p10 = scmp.lt.s32.totalorder %s4324_s15, %s4476_s22 }
 0x50b   : > { %p3802_p3 = scmp.lt.s32.totalorder %s3800_s4, %s3796_s30 }
 0x50c   : > { %p3798_p11 = pnand %p3797_p6, %p4477_p8 }
 0x50d   : > { %p3803_p9 = por %p3802_p3, %p3801_p10 }
 0x50e   : > { %p3799_p5 = pneg %p3798_p11 }
 0x510   : > { %p3804_p4 = pnand %p3803_p9, %p3799_p5 }
 0x512   : > { %3807 = shalt.err (!%p3804_p4)
}
 0x513   : > { %s3960_s10 = smov 128   ;;  %s3961_s16 = smov 256  }
 0x514   : > { %s3962_s27 = smov 8  }
 0x515   : > { %3082 = dma.vmem_to_hbm [thread:$0]  (%p4477_p8), %s4326_s24, 256, %s4324_s15, %s4331_s3, %s3960_s10, %s3961_s16, %s3962_s27  }
 0x516 PF: > { %s4478_s17 = sld [smem:[#allocation21_spill]]  ;;  %p3115_p2 = scmp.ge.s32.totalorder %s3942_s14, 2 }
 0x517   : > { %s4479_s21 = sld [smem:[#allocation29_spill]] }
 0x51c   : > { %s2552_s25 = sand.u32 1, %s4478_s17  }
 0x51d   : > { %p4480_p1 = scmp.ne.s32.totalorder %s4479_s21, 0  ;;  %s2553_s19 = scalar_lea.sflag [#allocation5], %s2552_s25 }
 0x51f   : > { %p3105_p13 = pnand %p3115_p2, %p4480_p1 }
 0x521   : > { %p3106_p7 = pneg %p3105_p13 }
 0x523   : > { %3885 = dma.done.wait (%p3106_p7), %s2553_s19, 256  }
 0x524   : > { %3887 = vsyncadd (%p3106_p7), %s2553_s19, 4294967040  ;;  %s30_s14 = sadd.s32 1, %s3942_s14   ;;  %s4482_s24 = sld [smem:[#allocation22_spill]] }
 0x525   : > { %p4359_p0 = scmp.ge.s32.totalorder %s30_s14, 6   ;;  %s4483_s27 = sld [smem:[#allocation23_spill]] }
 0x526   : > { %s4484_s20 = sld [smem:[#allocation30_spill]]  ;;  %s4487_s25 = smov %s3898_s26 }
 0x527   : > { %s4485_s15 = sld [smem:[#allocation31_spill]]  ;;  %s4488_s26 = smov %s4186_s5 }
 0x528   : > { %s4489_s28 = smov %s3910_s29  ;;  %s4490_s29 = smov %s4178_s18 }
 0x529   : > { %s4491_s30 = smov %s3918_s8  ;;  %s4492_s8 = smov %s3922_s9 }
 0x52a   : > { %s4493_s9 = smov %s4181_s2  ;;  %s4494_s10 = smov %s3934_s12 }
 0x52b   : > { %s4495_s11 = smov %s3938_s13  ;;  %29 = sbr.rel (!%p4359_p0) target bundleno = 21 (0x15), region = 136 }
 0x52c   : > { %s4496_s12 = smov %s4484_s20 }
 0x52d   : > { %s4497_s13 = smov %s4485_s15 }
 0x530   :  { %2558 = vsyncpa [#allocation4], 1 }
 0x531   :  { %2560 = vsyncpa [#allocation4 + $0x1], 1 }
 0x532   :  { %2561 = vsyncpa [#allocation7], 1 }
 0x533   :  { %2563 = vsyncpa [#allocation7 + $0x1], 1 }
 0x534   :  { %2564 = vsyncpa [#allocation10], 1 }
 0x535   :  { %2565 = vsyncpa [#allocation13], 1 }
 0x536   :  { %2567 = vsyncpa [#allocation13 + $0x1], 1 }
 0x537   :  { %2568 = vsyncpa [#allocation5], 1 }
 0x538   :  { %2570 = vsyncpa [#allocation5 + $0x1], 1 }

</bundles_post_ra>
